<compile_context>
chip_gen: v5e
topology: v5e:2x2
jax: 0.10.0
libtpu: 0.0.40
codegen_flags: <defaults>
</compile_context>

<pallas_src>
import functools

import jax
import jax.numpy as jnp
from jax.experimental import pallas as pl
from jax.experimental.pallas import tpu as pltpu

LN_EPS = 1e-5  # torch.nn.LayerNorm default


def _layernorm(v, gamma, beta):
    mean = jnp.mean(v, axis=-1, keepdims=True)
    var = jnp.mean(jnp.square(v - mean), axis=-1, keepdims=True)
    return (v - mean) * jax.lax.rsqrt(var + LN_EPS) * gamma + beta


def _gelu_exact(v):
    # torch nn.GELU() default = exact (erf) variant
    return 0.5 * v * (1.0 + jax.lax.erf(v * (2.0 ** -0.5)))


def linear_layer_kernel(heads, dim_head, has_share, *refs):
    """One (batch, query-tile) step."""
    dh = dim_head
    q_ref, k_ref, vw_ref, x_ref = refs[0], refs[1], refs[2], refs[3]
    rest = refs[4:]
    if has_share:
        share_ref, rest = rest[0], rest[1:]
    else:
        share_ref = None
    (bo_ref, lng_ref, lnb_ref, wpi_ref, bpi_ref,
     glng_ref, glnb_ref, wpo_ref, bpo_ref,
     gw_ref, gb_ref,
     y_ref, eout_ref,
     pin_ref, gate_ref, gated_ref) = rest[:16]
    pslab_ref = rest[16] if has_share else None

    tq = q_ref.shape[1]

    xq = x_ref[0]                                  # (tq, dim) f32
    vw32 = vw_ref[0].astype(jnp.float32)           # (n, dh)   V @ Wout (folded)
    bo = bo_ref[0]                                 # (dh,)

    # ---- energy: q (precomputed, scale folded into Wq) @ k^T ----
    energy = jax.lax.dot_general(
        q_ref[0], k_ref[0], (((1,), (1,)), ((), ())),
        preferred_element_type=jnp.float32)        # (tq, n)

    if has_share:
        # Per-head softmax probabilities go into an (H*tq, n) slab, then ONE
        # batched (H*tq, n) @ (n, dh) matmul replaces H short per-head matmuls.
        for h in range(heads):
            e_h = energy + share_ref[0, h]
            eout_ref[0, h] = e_h
            m = jnp.max(e_h, axis=-1, keepdims=True)
            p = jnp.exp(e_h - m)
            inv = pl.reciprocal(jnp.sum(p, axis=-1, keepdims=True), approx=True)
            pslab_ref[h * tq:(h + 1) * tq, :] = p * inv
        attn_all = jnp.dot(pslab_ref[...], vw32,
                           preferred_element_type=jnp.float32)   # (H*tq, dh)
        for h in range(heads):
            gated_ref[:, h * dh:(h + 1) * dh] = (
                attn_all[h * tq:(h + 1) * tq, :] + bo)
    else:
        # share is None: all heads see identical energy -> single softmax and a
        # single attention@V; energy is emitted once (broadcast in the wrapper).
        eout_ref[0, 0] = energy
        m = jnp.max(energy, axis=-1, keepdims=True)
        p = jnp.exp(energy - m)
        inv = pl.reciprocal(jnp.sum(p, axis=-1, keepdims=True), approx=True)
        attn = jnp.dot(p, vw32, preferred_element_type=jnp.float32) * inv + bo
        for h in range(heads):
            gated_ref[:, h * dh:(h + 1) * dh] = attn

    # ---- LayerNorm(x) -> proj_in -> GELU, staged through VMEM scratch ----
    norm_x = _layernorm(xq, lng_ref[0], lnb_ref[0])
    pin = jnp.dot(norm_x.astype(jnp.bfloat16), wpi_ref[...],
                  preferred_element_type=jnp.float32) + bpi_ref[0]
    pin_ref[...] = _gelu_exact(pin)                 # (tq, 2*H*dh)

    # ---- GatingUnit: per-head gate LayerNorm into a scratch slab ----
    gln_g = glng_ref[0]
    gln_b = glnb_ref[0]
    for h in range(heads):
        base = 2 * dh * h
        gate_ref[:, h * dh:(h + 1) * dh] = _layernorm(
            pin_ref[:, base + dh:base + 2 * dh], gln_g, gln_b)

    # 1x1 conv over heads = H^2 scalar(SMEM) * tile VPU accumulations; res /
    # gate / attn are sliced lazily from the scratch slabs (bounded vregs).
    for o in range(heads):
        conv = gate_ref[:, 0:dh] * gw_ref[o * heads]
        for h in range(1, heads):
            conv = conv + gate_ref[:, h * dh:(h + 1) * dh] * gw_ref[o * heads + h]
        res_o = pin_ref[:, 2 * dh * o:2 * dh * o + dh]
        attn_o = gated_ref[:, o * dh:(o + 1) * dh]
        gated_ref[:, o * dh:(o + 1) * dh] = (conv + gb_ref[o] + attn_o) * res_o

    # ---- proj_out + residual ----
    y = jnp.dot(gated_ref[...].astype(jnp.bfloat16), wpo_ref[...],
                preferred_element_type=jnp.float32) + bpo_ref[0]
    y_ref[0] = y + xq


def _vmem_capacity_bytes():
    try:
        return int(pltpu.get_tpu_info().vmem_capacity_bytes)
    except Exception:
        return 64 * 1024 * 1024   # conservative default (v7x per-TensorCore)


def _pick_tile(n, dim, heads, dh, has_share, budget_bytes, cap):
    """Largest query tile (multiple of 16, divides n) whose working set fits
    the VMEM budget; falls back to the full sequence for tiny/irregular n."""
    f4, b2 = 4, 2
    # per-batch resident blocks (double-buffered) + weights
    fixed = 2 * (2 * n * dh * b2)                                   # k, vw
    fixed += 2 * (dim * 2 * heads * dh + heads * dh * dim) * b2     # w_pi, w_po
    fixed += 2 * (4 * dim + 2 * heads * dh + 3 * dh) * f4           # small vecs

    def per_tile(t):
        h_out = heads if has_share else 1
        byt = 2 * t * dim * f4                  # x input
        byt += 2 * t * dh * b2                  # q input
        byt += 2 * t * dim * f4                 # y output
        byt += 2 * h_out * t * n * f4           # eout output
        byt += 3 * t * n * f4                   # in-flight energy/softmax temps
        if has_share:
            byt += 2 * heads * t * n * b2       # share input
            byt += heads * t * n * f4           # probability slab scratch
        byt += t * 2 * heads * dh * f4          # pin scratch
        byt += 2 * t * heads * dh * f4          # gate + gated scratch
        return byt

    cands = [t for t in range(16, min(cap, n) + 1, 16) if n % t == 0]
    for t in sorted(cands, reverse=True):
        if fixed + per_tile(t) <= budget_bytes:
            return t
    if cands:
        return cands[0]
    return n


def linear_layer_forward(x, share, params, *, tq_cap=512):
    b, n, dim = x.shape
    heads = int(params["heads"])
    dh = int(params["dim_head"])
    scale = float(dh) ** -0.5
    has_share = share is not None
    bf16 = jnp.bfloat16

    # ---- one-time prep (XLA): fold scale into Wq, fold to_out into Wv and
    # hoist the Q/K/V projections out of the kernel as one fused matmul ----
    w_qkv = params["w_qkv"]
    w_att = jnp.concatenate(
        [w_qkv[:, :dh] * scale,                  # Wq * dh^-0.5
         w_qkv[:, dh:2 * dh],                    # Wk
         w_qkv[:, 2 * dh:] @ params["w_out"]],   # Wv @ Wout
        axis=1)                                  # (dim, 3*dh)
    qkv = jnp.einsum("bnd,de->bne", x, w_att)    # (b, n, 3*dh)
    q_all = qkv[..., :dh].astype(bf16)
    k_all = qkv[..., dh:2 * dh].astype(bf16)
    v_all = qkv[..., 2 * dh:].astype(bf16)

    # ---- generation-aware tiling / VMEM limit ----
    vmem_cap = _vmem_capacity_bytes()
    vmem_limit = min(int(vmem_cap * 0.85), vmem_cap - 4 * 1024 * 1024)
    budget = max(vmem_limit - 4 * 1024 * 1024, 8 * 1024 * 1024)
    tq = _pick_tile(n, dim, heads, dh, has_share, budget, tq_cap)
    nq = n // tq
    h_out = heads if has_share else 1

    vmem_weights = [
        params["b_out"].reshape(1, dh),
        params["ln_g"].reshape(1, dim), params["ln_b"].reshape(1, dim),
        params["w_pi"].astype(bf16), params["b_pi"].reshape(1, 2 * heads * dh),
        params["gln_g"].reshape(1, dh), params["gln_b"].reshape(1, dh),
        params["w_po"].astype(bf16), params["b_po"].reshape(1, dim),
    ]
    smem_weights = [params["gw"].reshape(heads * heads), params["gb"]]

    def _const_vmem(a):
        nd = a.ndim
        return pl.BlockSpec(a.shape, lambda bi, qi, _nd=nd: (0,) * _nd)

    smem_spec = pl.BlockSpec(memory_space=pltpu.MemorySpace.SMEM)

    inputs = [q_all, k_all, v_all, x]
    in_specs = [
        pl.BlockSpec((1, tq, dh), lambda bi, qi: (bi, qi, 0)),    # q tile
        pl.BlockSpec((1, n, dh), lambda bi, qi: (bi, 0, 0)),      # K, per-batch resident
        pl.BlockSpec((1, n, dh), lambda bi, qi: (bi, 0, 0)),      # V@Wout, resident
        pl.BlockSpec((1, tq, dim), lambda bi, qi: (bi, qi, 0)),   # x tile
    ]
    if has_share:
        inputs.append(share.astype(bf16))
        in_specs.append(pl.BlockSpec((1, heads, tq, n),
                                     lambda bi, qi: (bi, 0, qi, 0)))
    inputs += vmem_weights + smem_weights
    in_specs += ([_const_vmem(a) for a in vmem_weights]
                 + [smem_spec] * len(smem_weights))

    out_specs = [
        pl.BlockSpec((1, tq, dim), lambda bi, qi: (bi, qi, 0)),
        pl.BlockSpec((1, h_out, tq, n), lambda bi, qi: (bi, 0, qi, 0)),
    ]
    out_shape = (
        jax.ShapeDtypeStruct((b, n, dim), jnp.float32),
        jax.ShapeDtypeStruct((b, h_out, n, n), jnp.float32),
    )

    scratch = [
        pltpu.VMEM((tq, 2 * heads * dh), jnp.float32),   # pin (post-GELU)
        pltpu.VMEM((tq, heads * dh), jnp.float32),       # layer-normed gates
        pltpu.VMEM((tq, heads * dh), jnp.float32),       # attn, then gated slab
    ]
    if has_share:
        scratch.append(pltpu.VMEM((heads * tq, n), jnp.float32))  # softmax probs

    kernel = functools.partial(linear_layer_kernel, heads, dh, has_share)

    y, eout = pl.pallas_call(
        kernel,
        out_shape=out_shape,
        grid_spec=pltpu.PrefetchScalarGridSpec(
            num_scalar_prefetch=0,
            grid=(b, nq),
            in_specs=in_specs,
            out_specs=out_specs,
            scratch_shapes=scratch,
        ),
        compiler_params=pltpu.CompilerParams(
            dimension_semantics=("parallel", "parallel"),
            vmem_limit_bytes=int(vmem_limit),
        ),
    )(*inputs)

    if not has_share:
        eout = jnp.broadcast_to(eout, (b, heads, n, n))
    return y, eout


def init_params(key, dim, dim_head, heads):
    ks = jax.random.split(key, 8)

    def lin(k, fin, fout):
        bound = 1.0 / (fin ** 0.5)
        return jax.random.uniform(k, (fin, fout), jnp.float32, -bound, bound)

    return dict(
        heads=heads, dim_head=dim_head,
        w_qkv=lin(ks[0], dim, 3 * dim_head),                       # to_qkv (no bias)
        w_out=lin(ks[1], dim_head, dim_head),                      # attention to_out
        b_out=jax.random.uniform(ks[2], (dim_head,), jnp.float32, -1, 1) / (dim_head ** 0.5),
        ln_g=jnp.ones((dim,), jnp.float32),                        # LayerNorm(dim)
        ln_b=jnp.zeros((dim,), jnp.float32),
        w_pi=lin(ks[3], dim, 2 * heads * dim_head),                # proj_in Linear
        b_pi=jax.random.uniform(ks[4], (2 * heads * dim_head,), jnp.float32, -1, 1) / (dim ** 0.5),
        gln_g=jnp.ones((dim_head,), jnp.float32),                  # GatingUnit LayerNorm
        gln_b=jnp.zeros((dim_head,), jnp.float32),
        # GatingUnit __init__: nn.init.constant_(weight, 0.), constant_(bias, 1.)
        gw=jnp.zeros((heads, heads), jnp.float32),
        gb=jnp.ones((heads,), jnp.float32),
        w_po=lin(ks[5], heads * dim_head, dim),                    # proj_out Linear
        b_po=jax.random.uniform(ks[6], (dim,), jnp.float32, -1, 1) / ((heads * dim_head) ** 0.5),
    )


def reference_forward(x, share, p):
    """Pure-JAX mirror of the PyTorch module for validation."""
    heads, dh = p["heads"], p["dim_head"]
    b, n, dim = x.shape
    qkv = x @ p["w_qkv"]
    q, k, v = jnp.split(qkv, 3, axis=-1)
    energy = jnp.einsum("bid,bjd->bij", q, k) * (dh ** -0.5)
    energy = jnp.broadcast_to(energy[:, None], (b, heads, n, n))
    if share is not None:
        energy = energy + share
    attw = jax.nn.softmax(energy, axis=-1)
    vv = jnp.broadcast_to(v[:, None], (b, heads, n, dh))
    attn = jnp.einsum("bhij,bhjd->bhid", attw, vv) @ p["w_out"] + p["b_out"]
    nx = _layernorm(x, p["ln_g"], p["ln_b"])
    pin = _gelu_exact(nx @ p["w_pi"] + p["b_pi"])
    out = pin.reshape(b, n, heads, 2 * dh).transpose(0, 2, 1, 3)
    res, gate = out[..., :dh], out[..., dh:]
    gate = _layernorm(gate, p["gln_g"], p["gln_b"])
    gate = jnp.einsum("oi,bind->bond", p["gw"], gate) + p["gb"][None, :, None, None]
    gated = (gate + attn) * res
    flat = gated.transpose(0, 2, 1, 3).reshape(b, n, heads * dh)
    y = flat @ p["w_po"] + p["b_po"]
    return y + x, energy


if __name__ == "__main__":
    def run_case(B, N, DIM, DIM_HEAD, HEADS, case_key, tq_cap=512, with_share=False):
        kx, kp, kgw, kgb, ksh = jax.random.split(case_key, 5)
        x = jax.random.normal(kx, (B, N, DIM), jnp.float32)
        params = init_params(kp, DIM, DIM_HEAD, HEADS)
        # perturb the gating-conv params away from their (0, 1) torch init so
        # the head-mixing path is exercised numerically
        params["gw"] = 0.5 * jax.random.normal(kgw, (HEADS, HEADS), jnp.float32)
        params["gb"] = params["gb"] + 0.1 * jax.random.normal(kgb, (HEADS,), jnp.float32)
        share = (0.1 * jax.random.normal(ksh, (B, HEADS, N, N), jnp.float32)
                 if with_share else None)

        y, eout = linear_layer_forward(x, share, params, tq_cap=tq_cap)
        jax.block_until_ready((y, eout))
        y_ref, e_ref = reference_forward(x, share, params)
        assert jnp.allclose(y, y_ref, rtol=2e-2, atol=2e-2), float(
            jnp.max(jnp.abs(y - y_ref)))
        assert jnp.allclose(eout, e_ref, rtol=2e-2, atol=2e-2), float(
            jnp.max(jnp.abs(eout - e_ref)))

    k1, k2, k3, k4 = jax.random.split(jax.random.PRNGKey(0), 4)
    # single-tile, share=None (dedup'd single-head eout path)
    run_case(2, 8, 32, 16, 4, k1, with_share=False)
    # single-tile, share provided (batched per-head attention@V path)
    run_case(2, 8, 32, 16, 4, k2, with_share=True)
    # multi-tile (nq=2): resident K/V reuse + tiled x/q/share/eout streams
    run_case(2, 64, 32, 16, 4, k3, tq_cap=32, with_share=False)
    run_case(2, 64, 32, 16, 4, k4, tq_cap=32, with_share=True)

    print("KERNEL_OK")
</pallas_src>

<mosaic_0001>
module attributes {stable_mosaic.version = 11 : i64} {
  func.func @linear_layer_kernel(%arg0: i32, %arg1: i32, %arg2: memref<1x8x16xbf16, #tpu.memory_space<vmem>>, %arg3: memref<1x8x16xbf16, #tpu.memory_space<vmem>>, %arg4: memref<1x8x16xbf16, #tpu.memory_space<vmem>>, %arg5: memref<1x8x32xf32, #tpu.memory_space<vmem>>, %arg6: memref<1x16xf32, #tpu.memory_space<vmem>>, %arg7: memref<1x32xf32, #tpu.memory_space<vmem>>, %arg8: memref<1x32xf32, #tpu.memory_space<vmem>>, %arg9: memref<32x128xbf16, #tpu.memory_space<vmem>>, %arg10: memref<1x128xf32, #tpu.memory_space<vmem>>, %arg11: memref<1x16xf32, #tpu.memory_space<vmem>>, %arg12: memref<1x16xf32, #tpu.memory_space<vmem>>, %arg13: memref<64x32xbf16, #tpu.memory_space<vmem>>, %arg14: memref<1x32xf32, #tpu.memory_space<vmem>>, %arg15: memref<16xf32, #tpu.memory_space<smem>>, %arg16: memref<4xf32, #tpu.memory_space<smem>>, %arg17: memref<1x8x32xf32, #tpu.memory_space<vmem>>, %arg18: memref<1x1x8x8xf32, #tpu.memory_space<vmem>>, %arg19: memref<8x128xf32, #tpu.memory_space<vmem>>, %arg20: memref<8x64xf32, #tpu.memory_space<vmem>>, %arg21: memref<8x64xf32, #tpu.memory_space<vmem>>) attributes {dimension_semantics = [#tpu.dimension_semantics<parallel>, #tpu.dimension_semantics<parallel>], iteration_bounds = array<i64: 2, 1>, scalar_prefetch = 0 : i64, scratch_operands = 3 : i64, tpu.core_type = #tpu.core_type<tc>, window_params = [{transform_indices = @transform_0, window_bounds = array<i64: 1, 8, 16>}, {transform_indices = @transform_1, window_bounds = array<i64: 1, 8, 16>}, {transform_indices = @transform_2, window_bounds = array<i64: 1, 8, 16>}, {transform_indices = @transform_3, window_bounds = array<i64: 1, 8, 32>}, {pipeline_mode = #tpu.pipeline_mode<synchronous>, transform_indices = @transform_4, window_bounds = array<i64: 1, 16>}, {pipeline_mode = #tpu.pipeline_mode<synchronous>, transform_indices = @transform_5, window_bounds = array<i64: 1, 32>}, {pipeline_mode = #tpu.pipeline_mode<synchronous>, transform_indices = @transform_6, window_bounds = array<i64: 1, 32>}, {pipeline_mode = #tpu.pipeline_mode<synchronous>, transform_indices = @transform_7, window_bounds = array<i64: 32, 128>}, {pipeline_mode = #tpu.pipeline_mode<synchronous>, transform_indices = @transform_8, window_bounds = array<i64: 1, 128>}, {pipeline_mode = #tpu.pipeline_mode<synchronous>, transform_indices = @transform_9, window_bounds = array<i64: 1, 16>}, {pipeline_mode = #tpu.pipeline_mode<synchronous>, transform_indices = @transform_10, window_bounds = array<i64: 1, 16>}, {pipeline_mode = #tpu.pipeline_mode<synchronous>, transform_indices = @transform_11, window_bounds = array<i64: 64, 32>}, {pipeline_mode = #tpu.pipeline_mode<synchronous>, transform_indices = @transform_12, window_bounds = array<i64: 1, 32>}, {transform_indices = @transform_13, window_bounds = array<i64: 16>}, {transform_indices = @transform_14, window_bounds = array<i64: 4>}, {transform_indices = @transform_15, window_bounds = array<i64: 1, 8, 32>}, {transform_indices = @transform_16, window_bounds = array<i64: 1, 1, 8, 8>}]} {
    %c0 = arith.constant 0 : index
    %c0_0 = arith.constant 0 : index
    %c0_1 = arith.constant 0 : index
    %0 = vector.load %arg5[%c0, %c0_0, %c0_1] : memref<1x8x32xf32, #tpu.memory_space<vmem>>, vector<1x8x32xf32>
    %1 = vector.shape_cast %0 : vector<1x8x32xf32> to vector<8x32xf32>
    %c0_2 = arith.constant 0 : index
    %c0_3 = arith.constant 0 : index
    %c0_4 = arith.constant 0 : index
    %2 = vector.load %arg4[%c0_2, %c0_3, %c0_4] : memref<1x8x16xbf16, #tpu.memory_space<vmem>>, vector<1x8x16xbf16>
    %3 = vector.shape_cast %2 : vector<1x8x16xbf16> to vector<8x16xbf16>
    %4 = arith.extf %3 : vector<8x16xbf16> to vector<8x16xf32>
    %c0_5 = arith.constant 0 : index
    %c0_6 = arith.constant 0 : index
    %5 = vector.load %arg6[%c0_5, %c0_6] : memref<1x16xf32, #tpu.memory_space<vmem>>, vector<1x16xf32>
    %6 = vector.shape_cast %5 : vector<1x16xf32> to vector<16xf32>
    %c0_7 = arith.constant 0 : index
    %c0_8 = arith.constant 0 : index
    %c0_9 = arith.constant 0 : index
    %7 = vector.load %arg2[%c0_7, %c0_8, %c0_9] : memref<1x8x16xbf16, #tpu.memory_space<vmem>>, vector<1x8x16xbf16>
    %8 = vector.shape_cast %7 : vector<1x8x16xbf16> to vector<8x16xbf16>
    %c0_10 = arith.constant 0 : index
    %c0_11 = arith.constant 0 : index
    %c0_12 = arith.constant 0 : index
    %9 = vector.load %arg3[%c0_10, %c0_11, %c0_12] : memref<1x8x16xbf16, #tpu.memory_space<vmem>>, vector<1x8x16xbf16>
    %10 = vector.shape_cast %9 : vector<1x8x16xbf16> to vector<8x16xbf16>
    %cst = arith.constant dense<0.000000e+00> : vector<8x8xf32>
    %11 = tpu.matmul %8, %10, %cst {dimension_numbers = #tpu.dot_dimension_numbers<[1], [1], [0], [0], [0, 0, 1, 0], [], []>} : vector<8x16xbf16>, vector<8x16xbf16>, vector<8x8xf32> -> vector<8x8xf32>
    %c0_13 = arith.constant 0 : index
    %c0_14 = arith.constant 0 : index
    %c0_15 = arith.constant 0 : index
    %c0_16 = arith.constant 0 : index
    %12 = vector.load %arg18[%c0_13, %c0_14, %c0_15, %c0_16] : memref<1x1x8x8xf32, #tpu.memory_space<vmem>>, vector<1x1x8x8xf32>
    %13 = vector.shape_cast %12 : vector<1x1x8x8xf32> to vector<8x8xf32>
    %14 = vector.shape_cast %11 : vector<8x8xf32> to vector<1x1x8x8xf32>
    tpu.vector_store %arg18[%c0_13, %c0_14, %c0_15, %c0_16], %14 {strides = array<i32>} : memref<1x1x8x8xf32, #tpu.memory_space<vmem>>, vector<1x1x8x8xf32>,
    %cst_17 = arith.constant dense<0xFF800000> : vector<8xf32>
    %15 = vector.multi_reduction <maximumf>, %11, %cst_17 [1] : vector<8x8xf32> to vector<8xf32>
    %16 = vector.shape_cast %15 : vector<8xf32> to vector<8x1xf32>
    %17 = vector.broadcast %16 : vector<8x1xf32> to vector<8x8xf32>
    %18 = arith.subf %11, %17 : vector<8x8xf32>
    %19 = math.exp %18 : vector<8x8xf32>
    %cst_18 = arith.constant dense<0.000000e+00> : vector<8xf32>
    %20 = vector.multi_reduction <add>, %19, %cst_18 [1] : vector<8x8xf32> to vector<8xf32>
    %21 = vector.shape_cast %20 : vector<8xf32> to vector<8x1xf32>
    %22 = tpu.reciprocal %21 {approx = true} : vector<8x1xf32> -> vector<8x1xf32>
    %cst_19 = arith.constant dense<0.000000e+00> : vector<8x16xf32>
    %23 = tpu.matmul %19, %4, %cst_19 {dimension_numbers = #tpu.dot_dimension_numbers<[1], [0], [0], [1], [0, 0, 1, 1], [], []>} : vector<8x8xf32>, vector<8x16xf32>, vector<8x16xf32> -> vector<8x16xf32>
    %24 = vector.broadcast %22 : vector<8x1xf32> to vector<8x16xf32>
    %25 = arith.mulf %23, %24 : vector<8x16xf32>
    %26 = vector.shape_cast %6 : vector<16xf32> to vector<1x16xf32>
    %27 = vector.broadcast %26 : vector<1x16xf32> to vector<8x16xf32>
    %28 = arith.addf %25, %27 : vector<8x16xf32>
    %c0_20 = arith.constant 0 : index
    %c0_21 = arith.constant 0 : index
    %29 = vector.load %arg21[%c0_20, %c0_21] : memref<8x64xf32, #tpu.memory_space<vmem>>, vector<8x16xf32>
    tpu.vector_store %arg21[%c0_20, %c0_21], %28 {strides = array<i32>} : memref<8x64xf32, #tpu.memory_space<vmem>>, vector<8x16xf32>,
    %c0_22 = arith.constant 0 : index
    %c16 = arith.constant 16 : index
    %30 = vector.load %arg21[%c0_22, %c16] : memref<8x64xf32, #tpu.memory_space<vmem>>, vector<8x16xf32>
    tpu.vector_store %arg21[%c0_22, %c16], %28 {strides = array<i32>} : memref<8x64xf32, #tpu.memory_space<vmem>>, vector<8x16xf32>,
    %c0_23 = arith.constant 0 : index
    %c32 = arith.constant 32 : index
    %31 = vector.load %arg21[%c0_23, %c32] : memref<8x64xf32, #tpu.memory_space<vmem>>, vector<8x16xf32>
    tpu.vector_store %arg21[%c0_23, %c32], %28 {strides = array<i32>} : memref<8x64xf32, #tpu.memory_space<vmem>>, vector<8x16xf32>,
    %c0_24 = arith.constant 0 : index
    %c48 = arith.constant 48 : index
    %32 = vector.load %arg21[%c0_24, %c48] : memref<8x64xf32, #tpu.memory_space<vmem>>, vector<8x16xf32>
    tpu.vector_store %arg21[%c0_24, %c48], %28 {strides = array<i32>} : memref<8x64xf32, #tpu.memory_space<vmem>>, vector<8x16xf32>,
    %c0_25 = arith.constant 0 : index
    %c0_26 = arith.constant 0 : index
    %33 = vector.load %arg7[%c0_25, %c0_26] : memref<1x32xf32, #tpu.memory_space<vmem>>, vector<1x32xf32>
    %34 = vector.shape_cast %33 : vector<1x32xf32> to vector<32xf32>
    %c0_27 = arith.constant 0 : index
    %c0_28 = arith.constant 0 : index
    %35 = vector.load %arg8[%c0_27, %c0_28] : memref<1x32xf32, #tpu.memory_space<vmem>>, vector<1x32xf32>
    %36 = vector.shape_cast %35 : vector<1x32xf32> to vector<32xf32>
    %cst_29 = arith.constant dense<0.000000e+00> : vector<8xf32>
    %37 = vector.multi_reduction <add>, %1, %cst_29 [1] : vector<8x32xf32> to vector<8xf32>
    %38 = vector.shape_cast %37 : vector<8xf32> to vector<8x1xf32>
    %cst_30 = arith.constant 3.200000e+01 : f32
    %39 = vector.broadcast %cst_30 : f32 to vector<8x1xf32>
    %40 = arith.divf %38, %39 : vector<8x1xf32>
    %41 = vector.broadcast %40 : vector<8x1xf32> to vector<8x32xf32>
    %42 = arith.subf %1, %41 : vector<8x32xf32>
    %43 = arith.mulf %42, %42 : vector<8x32xf32>
    %cst_31 = arith.constant dense<0.000000e+00> : vector<8xf32>
    %44 = vector.multi_reduction <add>, %43, %cst_31 [1] : vector<8x32xf32> to vector<8xf32>
    %45 = vector.shape_cast %44 : vector<8xf32> to vector<8x1xf32>
    %cst_32 = arith.constant 3.200000e+01 : f32
    %46 = vector.broadcast %cst_32 : f32 to vector<8x1xf32>
    %47 = arith.divf %45, %46 : vector<8x1xf32>
    %48 = vector.broadcast %40 : vector<8x1xf32> to vector<8x32xf32>
    %49 = arith.subf %1, %48 : vector<8x32xf32>
    %cst_33 = arith.constant 9.99999974E-6 : f32
    %50 = vector.broadcast %cst_33 : f32 to vector<8x1xf32>
    %51 = arith.addf %47, %50 : vector<8x1xf32>
    %52 = math.rsqrt %51 : vector<8x1xf32>
    %53 = vector.broadcast %52 : vector<8x1xf32> to vector<8x32xf32>
    %54 = arith.mulf %49, %53 : vector<8x32xf32>
    %55 = vector.shape_cast %34 : vector<32xf32> to vector<1x32xf32>
    %56 = vector.broadcast %55 : vector<1x32xf32> to vector<8x32xf32>
    %57 = arith.mulf %54, %56 : vector<8x32xf32>
    %58 = vector.shape_cast %36 : vector<32xf32> to vector<1x32xf32>
    %59 = vector.broadcast %58 : vector<1x32xf32> to vector<8x32xf32>
    %60 = arith.addf %57, %59 : vector<8x32xf32>
    %61 = arith.truncf %60 : vector<8x32xf32> to vector<8x32xbf16>
    %c0_34 = arith.constant 0 : index
    %c0_35 = arith.constant 0 : index
    %62 = vector.load %arg9[%c0_34, %c0_35] : memref<32x128xbf16, #tpu.memory_space<vmem>>, vector<32x128xbf16>
    %cst_36 = arith.constant dense<0.000000e+00> : vector<8x128xf32>
    %63 = tpu.matmul %61, %62, %cst_36 {dimension_numbers = #tpu.dot_dimension_numbers<[1], [0], [0], [1], [0, 0, 1, 1], [], []>} : vector<8x32xbf16>, vector<32x128xbf16>, vector<8x128xf32> -> vector<8x128xf32>
    %c0_37 = arith.constant 0 : index
    %c0_38 = arith.constant 0 : index
    %64 = vector.load %arg10[%c0_37, %c0_38] : memref<1x128xf32, #tpu.memory_space<vmem>>, vector<1x128xf32>
    %65 = vector.shape_cast %64 : vector<1x128xf32> to vector<128xf32>
    %66 = vector.shape_cast %65 : vector<128xf32> to vector<1x128xf32>
    %67 = vector.broadcast %66 : vector<1x128xf32> to vector<8x128xf32>
    %68 = arith.addf %63, %67 : vector<8x128xf32>
    %cst_39 = arith.constant 5.000000e-01 : f32
    %69 = vector.broadcast %cst_39 : f32 to vector<8x128xf32>
    %70 = arith.mulf %69, %68 : vector<8x128xf32>
    %cst_40 = arith.constant 0.707106769 : f32
    %71 = vector.broadcast %cst_40 : f32 to vector<8x128xf32>
    %72 = arith.mulf %68, %71 : vector<8x128xf32>
    %73 = math.erf %72 : vector<8x128xf32>
    %cst_41 = arith.constant 1.000000e+00 : f32
    %74 = vector.broadcast %cst_41 : f32 to vector<8x128xf32>
    %75 = arith.addf %74, %73 : vector<8x128xf32>
    %76 = arith.mulf %70, %75 : vector<8x128xf32>
    %c0_42 = arith.constant 0 : index
    %c0_43 = arith.constant 0 : index
    %77 = vector.load %arg19[%c0_42, %c0_43] : memref<8x128xf32, #tpu.memory_space<vmem>>, vector<8x128xf32>
    tpu.vector_store %arg19[%c0_42, %c0_43], %76 {strides = array<i32>} : memref<8x128xf32, #tpu.memory_space<vmem>>, vector<8x128xf32>,
    %c0_44 = arith.constant 0 : index
    %c0_45 = arith.constant 0 : index
    %78 = vector.load %arg11[%c0_44, %c0_45] : memref<1x16xf32, #tpu.memory_space<vmem>>, vector<1x16xf32>
    %79 = vector.shape_cast %78 : vector<1x16xf32> to vector<16xf32>
    %c0_46 = arith.constant 0 : index
    %c0_47 = arith.constant 0 : index
    %80 = vector.load %arg12[%c0_46, %c0_47] : memref<1x16xf32, #tpu.memory_space<vmem>>, vector<1x16xf32>
    %81 = vector.shape_cast %80 : vector<1x16xf32> to vector<16xf32>
    %c0_48 = arith.constant 0 : index
    %c16_49 = arith.constant 16 : index
    %82 = vector.load %arg19[%c0_48, %c16_49] : memref<8x128xf32, #tpu.memory_space<vmem>>, vector<8x16xf32>
    %cst_50 = arith.constant dense<0.000000e+00> : vector<8xf32>
    %83 = vector.multi_reduction <add>, %82, %cst_50 [1] : vector<8x16xf32> to vector<8xf32>
    %84 = vector.shape_cast %83 : vector<8xf32> to vector<8x1xf32>
    %cst_51 = arith.constant 1.600000e+01 : f32
    %85 = vector.broadcast %cst_51 : f32 to vector<8x1xf32>
    %86 = arith.divf %84, %85 : vector<8x1xf32>
    %87 = vector.broadcast %86 : vector<8x1xf32> to vector<8x16xf32>
    %88 = arith.subf %82, %87 : vector<8x16xf32>
    %89 = arith.mulf %88, %88 : vector<8x16xf32>
    %cst_52 = arith.constant dense<0.000000e+00> : vector<8xf32>
    %90 = vector.multi_reduction <add>, %89, %cst_52 [1] : vector<8x16xf32> to vector<8xf32>
    %91 = vector.shape_cast %90 : vector<8xf32> to vector<8x1xf32>
    %cst_53 = arith.constant 1.600000e+01 : f32
    %92 = vector.broadcast %cst_53 : f32 to vector<8x1xf32>
    %93 = arith.divf %91, %92 : vector<8x1xf32>
    %94 = vector.broadcast %86 : vector<8x1xf32> to vector<8x16xf32>
    %95 = arith.subf %82, %94 : vector<8x16xf32>
    %cst_54 = arith.constant 9.99999974E-6 : f32
    %96 = vector.broadcast %cst_54 : f32 to vector<8x1xf32>
    %97 = arith.addf %93, %96 : vector<8x1xf32>
    %98 = math.rsqrt %97 : vector<8x1xf32>
    %99 = vector.broadcast %98 : vector<8x1xf32> to vector<8x16xf32>
    %100 = arith.mulf %95, %99 : vector<8x16xf32>
    %101 = vector.shape_cast %79 : vector<16xf32> to vector<1x16xf32>
    %102 = vector.broadcast %101 : vector<1x16xf32> to vector<8x16xf32>
    %103 = arith.mulf %100, %102 : vector<8x16xf32>
    %104 = vector.shape_cast %81 : vector<16xf32> to vector<1x16xf32>
    %105 = vector.broadcast %104 : vector<1x16xf32> to vector<8x16xf32>
    %106 = arith.addf %103, %105 : vector<8x16xf32>
    %c0_55 = arith.constant 0 : index
    %c0_56 = arith.constant 0 : index
    %107 = vector.load %arg20[%c0_55, %c0_56] : memref<8x64xf32, #tpu.memory_space<vmem>>, vector<8x16xf32>
    tpu.vector_store %arg20[%c0_55, %c0_56], %106 {strides = array<i32>} : memref<8x64xf32, #tpu.memory_space<vmem>>, vector<8x16xf32>,
    %c0_57 = arith.constant 0 : index
    %c48_58 = arith.constant 48 : index
    %108 = vector.load %arg19[%c0_57, %c48_58] : memref<8x128xf32, #tpu.memory_space<vmem>>, vector<8x16xf32>
    %cst_59 = arith.constant dense<0.000000e+00> : vector<8xf32>
    %109 = vector.multi_reduction <add>, %108, %cst_59 [1] : vector<8x16xf32> to vector<8xf32>
    %110 = vector.shape_cast %109 : vector<8xf32> to vector<8x1xf32>
    %cst_60 = arith.constant 1.600000e+01 : f32
    %111 = vector.broadcast %cst_60 : f32 to vector<8x1xf32>
    %112 = arith.divf %110, %111 : vector<8x1xf32>
    %113 = vector.broadcast %112 : vector<8x1xf32> to vector<8x16xf32>
    %114 = arith.subf %108, %113 : vector<8x16xf32>
    %115 = arith.mulf %114, %114 : vector<8x16xf32>
    %cst_61 = arith.constant dense<0.000000e+00> : vector<8xf32>
    %116 = vector.multi_reduction <add>, %115, %cst_61 [1] : vector<8x16xf32> to vector<8xf32>
    %117 = vector.shape_cast %116 : vector<8xf32> to vector<8x1xf32>
    %cst_62 = arith.constant 1.600000e+01 : f32
    %118 = vector.broadcast %cst_62 : f32 to vector<8x1xf32>
    %119 = arith.divf %117, %118 : vector<8x1xf32>
    %120 = vector.broadcast %112 : vector<8x1xf32> to vector<8x16xf32>
    %121 = arith.subf %108, %120 : vector<8x16xf32>
    %cst_63 = arith.constant 9.99999974E-6 : f32
    %122 = vector.broadcast %cst_63 : f32 to vector<8x1xf32>
    %123 = arith.addf %119, %122 : vector<8x1xf32>
    %124 = math.rsqrt %123 : vector<8x1xf32>
    %125 = vector.broadcast %124 : vector<8x1xf32> to vector<8x16xf32>
    %126 = arith.mulf %121, %125 : vector<8x16xf32>
    %127 = vector.shape_cast %79 : vector<16xf32> to vector<1x16xf32>
    %128 = vector.broadcast %127 : vector<1x16xf32> to vector<8x16xf32>
    %129 = arith.mulf %126, %128 : vector<8x16xf32>
    %130 = vector.shape_cast %81 : vector<16xf32> to vector<1x16xf32>
    %131 = vector.broadcast %130 : vector<1x16xf32> to vector<8x16xf32>
    %132 = arith.addf %129, %131 : vector<8x16xf32>
    %c0_64 = arith.constant 0 : index
    %c16_65 = arith.constant 16 : index
    %133 = vector.load %arg20[%c0_64, %c16_65] : memref<8x64xf32, #tpu.memory_space<vmem>>, vector<8x16xf32>
    tpu.vector_store %arg20[%c0_64, %c16_65], %132 {strides = array<i32>} : memref<8x64xf32, #tpu.memory_space<vmem>>, vector<8x16xf32>,
    %c0_66 = arith.constant 0 : index
    %c80 = arith.constant 80 : index
    %134 = vector.load %arg19[%c0_66, %c80] : memref<8x128xf32, #tpu.memory_space<vmem>>, vector<8x16xf32>
    %cst_67 = arith.constant dense<0.000000e+00> : vector<8xf32>
    %135 = vector.multi_reduction <add>, %134, %cst_67 [1] : vector<8x16xf32> to vector<8xf32>
    %136 = vector.shape_cast %135 : vector<8xf32> to vector<8x1xf32>
    %cst_68 = arith.constant 1.600000e+01 : f32
    %137 = vector.broadcast %cst_68 : f32 to vector<8x1xf32>
    %138 = arith.divf %136, %137 : vector<8x1xf32>
    %139 = vector.broadcast %138 : vector<8x1xf32> to vector<8x16xf32>
    %140 = arith.subf %134, %139 : vector<8x16xf32>
    %141 = arith.mulf %140, %140 : vector<8x16xf32>
    %cst_69 = arith.constant dense<0.000000e+00> : vector<8xf32>
    %142 = vector.multi_reduction <add>, %141, %cst_69 [1] : vector<8x16xf32> to vector<8xf32>
    %143 = vector.shape_cast %142 : vector<8xf32> to vector<8x1xf32>
    %cst_70 = arith.constant 1.600000e+01 : f32
    %144 = vector.broadcast %cst_70 : f32 to vector<8x1xf32>
    %145 = arith.divf %143, %144 : vector<8x1xf32>
    %146 = vector.broadcast %138 : vector<8x1xf32> to vector<8x16xf32>
    %147 = arith.subf %134, %146 : vector<8x16xf32>
    %cst_71 = arith.constant 9.99999974E-6 : f32
    %148 = vector.broadcast %cst_71 : f32 to vector<8x1xf32>
    %149 = arith.addf %145, %148 : vector<8x1xf32>
    %150 = math.rsqrt %149 : vector<8x1xf32>
    %151 = vector.broadcast %150 : vector<8x1xf32> to vector<8x16xf32>
    %152 = arith.mulf %147, %151 : vector<8x16xf32>
    %153 = vector.shape_cast %79 : vector<16xf32> to vector<1x16xf32>
    %154 = vector.broadcast %153 : vector<1x16xf32> to vector<8x16xf32>
    %155 = arith.mulf %152, %154 : vector<8x16xf32>
    %156 = vector.shape_cast %81 : vector<16xf32> to vector<1x16xf32>
    %157 = vector.broadcast %156 : vector<1x16xf32> to vector<8x16xf32>
    %158 = arith.addf %155, %157 : vector<8x16xf32>
    %c0_72 = arith.constant 0 : index
    %c32_73 = arith.constant 32 : index
    %159 = vector.load %arg20[%c0_72, %c32_73] : memref<8x64xf32, #tpu.memory_space<vmem>>, vector<8x16xf32>
    tpu.vector_store %arg20[%c0_72, %c32_73], %158 {strides = array<i32>} : memref<8x64xf32, #tpu.memory_space<vmem>>, vector<8x16xf32>,
    %c0_74 = arith.constant 0 : index
    %c112 = arith.constant 112 : index
    %160 = vector.load %arg19[%c0_74, %c112] : memref<8x128xf32, #tpu.memory_space<vmem>>, vector<8x16xf32>
    %cst_75 = arith.constant dense<0.000000e+00> : vector<8xf32>
    %161 = vector.multi_reduction <add>, %160, %cst_75 [1] : vector<8x16xf32> to vector<8xf32>
    %162 = vector.shape_cast %161 : vector<8xf32> to vector<8x1xf32>
    %cst_76 = arith.constant 1.600000e+01 : f32
    %163 = vector.broadcast %cst_76 : f32 to vector<8x1xf32>
    %164 = arith.divf %162, %163 : vector<8x1xf32>
    %165 = vector.broadcast %164 : vector<8x1xf32> to vector<8x16xf32>
    %166 = arith.subf %160, %165 : vector<8x16xf32>
    %167 = arith.mulf %166, %166 : vector<8x16xf32>
    %cst_77 = arith.constant dense<0.000000e+00> : vector<8xf32>
    %168 = vector.multi_reduction <add>, %167, %cst_77 [1] : vector<8x16xf32> to vector<8xf32>
    %169 = vector.shape_cast %168 : vector<8xf32> to vector<8x1xf32>
    %cst_78 = arith.constant 1.600000e+01 : f32
    %170 = vector.broadcast %cst_78 : f32 to vector<8x1xf32>
    %171 = arith.divf %169, %170 : vector<8x1xf32>
    %172 = vector.broadcast %164 : vector<8x1xf32> to vector<8x16xf32>
    %173 = arith.subf %160, %172 : vector<8x16xf32>
    %cst_79 = arith.constant 9.99999974E-6 : f32
    %174 = vector.broadcast %cst_79 : f32 to vector<8x1xf32>
    %175 = arith.addf %171, %174 : vector<8x1xf32>
    %176 = math.rsqrt %175 : vector<8x1xf32>
    %177 = vector.broadcast %176 : vector<8x1xf32> to vector<8x16xf32>
    %178 = arith.mulf %173, %177 : vector<8x16xf32>
    %179 = vector.shape_cast %79 : vector<16xf32> to vector<1x16xf32>
    %180 = vector.broadcast %179 : vector<1x16xf32> to vector<8x16xf32>
    %181 = arith.mulf %178, %180 : vector<8x16xf32>
    %182 = vector.shape_cast %81 : vector<16xf32> to vector<1x16xf32>
    %183 = vector.broadcast %182 : vector<1x16xf32> to vector<8x16xf32>
    %184 = arith.addf %181, %183 : vector<8x16xf32>
    %c0_80 = arith.constant 0 : index
    %c48_81 = arith.constant 48 : index
    %185 = vector.load %arg20[%c0_80, %c48_81] : memref<8x64xf32, #tpu.memory_space<vmem>>, vector<8x16xf32>
    tpu.vector_store %arg20[%c0_80, %c48_81], %184 {strides = array<i32>} : memref<8x64xf32, #tpu.memory_space<vmem>>, vector<8x16xf32>,
    %c0_82 = arith.constant 0 : index
    %c0_83 = arith.constant 0 : index
    %186 = vector.load %arg20[%c0_82, %c0_83] : memref<8x64xf32, #tpu.memory_space<vmem>>, vector<8x16xf32>
    %c0_84 = arith.constant 0 : index
    %187 = memref.load %arg15[%c0_84] : memref<16xf32, #tpu.memory_space<smem>>
    %188 = vector.broadcast %187 : f32 to vector<8x16xf32>
    %189 = arith.mulf %186, %188 : vector<8x16xf32>
    %c0_85 = arith.constant 0 : index
    %c16_86 = arith.constant 16 : index
    %190 = vector.load %arg20[%c0_85, %c16_86] : memref<8x64xf32, #tpu.memory_space<vmem>>, vector<8x16xf32>
    %c1 = arith.constant 1 : index
    %191 = memref.load %arg15[%c1] : memref<16xf32, #tpu.memory_space<smem>>
    %192 = vector.broadcast %191 : f32 to vector<8x16xf32>
    %193 = arith.mulf %190, %192 : vector<8x16xf32>
    %194 = arith.addf %189, %193 : vector<8x16xf32>
    %c0_87 = arith.constant 0 : index
    %c32_88 = arith.constant 32 : index
    %195 = vector.load %arg20[%c0_87, %c32_88] : memref<8x64xf32, #tpu.memory_space<vmem>>, vector<8x16xf32>
    %c2 = arith.constant 2 : index
    %196 = memref.load %arg15[%c2] : memref<16xf32, #tpu.memory_space<smem>>
    %197 = vector.broadcast %196 : f32 to vector<8x16xf32>
    %198 = arith.mulf %195, %197 : vector<8x16xf32>
    %199 = arith.addf %194, %198 : vector<8x16xf32>
    %c0_89 = arith.constant 0 : index
    %c48_90 = arith.constant 48 : index
    %200 = vector.load %arg20[%c0_89, %c48_90] : memref<8x64xf32, #tpu.memory_space<vmem>>, vector<8x16xf32>
    %c3 = arith.constant 3 : index
    %201 = memref.load %arg15[%c3] : memref<16xf32, #tpu.memory_space<smem>>
    %202 = vector.broadcast %201 : f32 to vector<8x16xf32>
    %203 = arith.mulf %200, %202 : vector<8x16xf32>
    %204 = arith.addf %199, %203 : vector<8x16xf32>
    %c0_91 = arith.constant 0 : index
    %c0_92 = arith.constant 0 : index
    %205 = vector.load %arg19[%c0_91, %c0_92] : memref<8x128xf32, #tpu.memory_space<vmem>>, vector<8x16xf32>
    %c0_93 = arith.constant 0 : index
    %c0_94 = arith.constant 0 : index
    %206 = vector.load %arg21[%c0_93, %c0_94] : memref<8x64xf32, #tpu.memory_space<vmem>>, vector<8x16xf32>
    %c0_95 = arith.constant 0 : index
    %207 = memref.load %arg16[%c0_95] : memref<4xf32, #tpu.memory_space<smem>>
    %208 = vector.broadcast %207 : f32 to vector<8x16xf32>
    %209 = arith.addf %204, %208 : vector<8x16xf32>
    %210 = arith.addf %209, %206 : vector<8x16xf32>
    %211 = arith.mulf %210, %205 : vector<8x16xf32>
    %c0_96 = arith.constant 0 : index
    %c0_97 = arith.constant 0 : index
    %212 = vector.load %arg21[%c0_96, %c0_97] : memref<8x64xf32, #tpu.memory_space<vmem>>, vector<8x16xf32>
    tpu.vector_store %arg21[%c0_96, %c0_97], %211 {strides = array<i32>} : memref<8x64xf32, #tpu.memory_space<vmem>>, vector<8x16xf32>,
    %c0_98 = arith.constant 0 : index
    %c0_99 = arith.constant 0 : index
    %213 = vector.load %arg20[%c0_98, %c0_99] : memref<8x64xf32, #tpu.memory_space<vmem>>, vector<8x16xf32>
    %c4 = arith.constant 4 : index
    %214 = memref.load %arg15[%c4] : memref<16xf32, #tpu.memory_space<smem>>
    %215 = vector.broadcast %214 : f32 to vector<8x16xf32>
    %216 = arith.mulf %213, %215 : vector<8x16xf32>
    %c0_100 = arith.constant 0 : index
    %c16_101 = arith.constant 16 : index
    %217 = vector.load %arg20[%c0_100, %c16_101] : memref<8x64xf32, #tpu.memory_space<vmem>>, vector<8x16xf32>
    %c5 = arith.constant 5 : index
    %218 = memref.load %arg15[%c5] : memref<16xf32, #tpu.memory_space<smem>>
    %219 = vector.broadcast %218 : f32 to vector<8x16xf32>
    %220 = arith.mulf %217, %219 : vector<8x16xf32>
    %221 = arith.addf %216, %220 : vector<8x16xf32>
    %c0_102 = arith.constant 0 : index
    %c32_103 = arith.constant 32 : index
    %222 = vector.load %arg20[%c0_102, %c32_103] : memref<8x64xf32, #tpu.memory_space<vmem>>, vector<8x16xf32>
    %c6 = arith.constant 6 : index
    %223 = memref.load %arg15[%c6] : memref<16xf32, #tpu.memory_space<smem>>
    %224 = vector.broadcast %223 : f32 to vector<8x16xf32>
    %225 = arith.mulf %222, %224 : vector<8x16xf32>
    %226 = arith.addf %221, %225 : vector<8x16xf32>
    %c0_104 = arith.constant 0 : index
    %c48_105 = arith.constant 48 : index
    %227 = vector.load %arg20[%c0_104, %c48_105] : memref<8x64xf32, #tpu.memory_space<vmem>>, vector<8x16xf32>
    %c7 = arith.constant 7 : index
    %228 = memref.load %arg15[%c7] : memref<16xf32, #tpu.memory_space<smem>>
    %229 = vector.broadcast %228 : f32 to vector<8x16xf32>
    %230 = arith.mulf %227, %229 : vector<8x16xf32>
    %231 = arith.addf %226, %230 : vector<8x16xf32>
    %c0_106 = arith.constant 0 : index
    %c32_107 = arith.constant 32 : index
    %232 = vector.load %arg19[%c0_106, %c32_107] : memref<8x128xf32, #tpu.memory_space<vmem>>, vector<8x16xf32>
    %c0_108 = arith.constant 0 : index
    %c16_109 = arith.constant 16 : index
    %233 = vector.load %arg21[%c0_108, %c16_109] : memref<8x64xf32, #tpu.memory_space<vmem>>, vector<8x16xf32>
    %c1_110 = arith.constant 1 : index
    %234 = memref.load %arg16[%c1_110] : memref<4xf32, #tpu.memory_space<smem>>
    %235 = vector.broadcast %234 : f32 to vector<8x16xf32>
    %236 = arith.addf %231, %235 : vector<8x16xf32>
    %237 = arith.addf %236, %233 : vector<8x16xf32>
    %238 = arith.mulf %237, %232 : vector<8x16xf32>
    %c0_111 = arith.constant 0 : index
    %c16_112 = arith.constant 16 : index
    %239 = vector.load %arg21[%c0_111, %c16_112] : memref<8x64xf32, #tpu.memory_space<vmem>>, vector<8x16xf32>
    tpu.vector_store %arg21[%c0_111, %c16_112], %238 {strides = array<i32>} : memref<8x64xf32, #tpu.memory_space<vmem>>, vector<8x16xf32>,
    %c0_113 = arith.constant 0 : index
    %c0_114 = arith.constant 0 : index
    %240 = vector.load %arg20[%c0_113, %c0_114] : memref<8x64xf32, #tpu.memory_space<vmem>>, vector<8x16xf32>
    %c8 = arith.constant 8 : index
    %241 = memref.load %arg15[%c8] : memref<16xf32, #tpu.memory_space<smem>>
    %242 = vector.broadcast %241 : f32 to vector<8x16xf32>
    %243 = arith.mulf %240, %242 : vector<8x16xf32>
    %c0_115 = arith.constant 0 : index
    %c16_116 = arith.constant 16 : index
    %244 = vector.load %arg20[%c0_115, %c16_116] : memref<8x64xf32, #tpu.memory_space<vmem>>, vector<8x16xf32>
    %c9 = arith.constant 9 : index
    %245 = memref.load %arg15[%c9] : memref<16xf32, #tpu.memory_space<smem>>
    %246 = vector.broadcast %245 : f32 to vector<8x16xf32>
    %247 = arith.mulf %244, %246 : vector<8x16xf32>
    %248 = arith.addf %243, %247 : vector<8x16xf32>
    %c0_117 = arith.constant 0 : index
    %c32_118 = arith.constant 32 : index
    %249 = vector.load %arg20[%c0_117, %c32_118] : memref<8x64xf32, #tpu.memory_space<vmem>>, vector<8x16xf32>
    %c10 = arith.constant 10 : index
    %250 = memref.load %arg15[%c10] : memref<16xf32, #tpu.memory_space<smem>>
    %251 = vector.broadcast %250 : f32 to vector<8x16xf32>
    %252 = arith.mulf %249, %251 : vector<8x16xf32>
    %253 = arith.addf %248, %252 : vector<8x16xf32>
    %c0_119 = arith.constant 0 : index
    %c48_120 = arith.constant 48 : index
    %254 = vector.load %arg20[%c0_119, %c48_120] : memref<8x64xf32, #tpu.memory_space<vmem>>, vector<8x16xf32>
    %c11 = arith.constant 11 : index
    %255 = memref.load %arg15[%c11] : memref<16xf32, #tpu.memory_space<smem>>
    %256 = vector.broadcast %255 : f32 to vector<8x16xf32>
    %257 = arith.mulf %254, %256 : vector<8x16xf32>
    %258 = arith.addf %253, %257 : vector<8x16xf32>
    %c0_121 = arith.constant 0 : index
    %c64 = arith.constant 64 : index
    %259 = vector.load %arg19[%c0_121, %c64] : memref<8x128xf32, #tpu.memory_space<vmem>>, vector<8x16xf32>
    %c0_122 = arith.constant 0 : index
    %c32_123 = arith.constant 32 : index
    %260 = vector.load %arg21[%c0_122, %c32_123] : memref<8x64xf32, #tpu.memory_space<vmem>>, vector<8x16xf32>
    %c2_124 = arith.constant 2 : index
    %261 = memref.load %arg16[%c2_124] : memref<4xf32, #tpu.memory_space<smem>>
    %262 = vector.broadcast %261 : f32 to vector<8x16xf32>
    %263 = arith.addf %258, %262 : vector<8x16xf32>
    %264 = arith.addf %263, %260 : vector<8x16xf32>
    %265 = arith.mulf %264, %259 : vector<8x16xf32>
    %c0_125 = arith.constant 0 : index
    %c32_126 = arith.constant 32 : index
    %266 = vector.load %arg21[%c0_125, %c32_126] : memref<8x64xf32, #tpu.memory_space<vmem>>, vector<8x16xf32>
    tpu.vector_store %arg21[%c0_125, %c32_126], %265 {strides = array<i32>} : memref<8x64xf32, #tpu.memory_space<vmem>>, vector<8x16xf32>,
    %c0_127 = arith.constant 0 : index
    %c0_128 = arith.constant 0 : index
    %267 = vector.load %arg20[%c0_127, %c0_128] : memref<8x64xf32, #tpu.memory_space<vmem>>, vector<8x16xf32>
    %c12 = arith.constant 12 : index
    %268 = memref.load %arg15[%c12] : memref<16xf32, #tpu.memory_space<smem>>
    %269 = vector.broadcast %268 : f32 to vector<8x16xf32>
    %270 = arith.mulf %267, %269 : vector<8x16xf32>
    %c0_129 = arith.constant 0 : index
    %c16_130 = arith.constant 16 : index
    %271 = vector.load %arg20[%c0_129, %c16_130] : memref<8x64xf32, #tpu.memory_space<vmem>>, vector<8x16xf32>
    %c13 = arith.constant 13 : index
    %272 = memref.load %arg15[%c13] : memref<16xf32, #tpu.memory_space<smem>>
    %273 = vector.broadcast %272 : f32 to vector<8x16xf32>
    %274 = arith.mulf %271, %273 : vector<8x16xf32>
    %275 = arith.addf %270, %274 : vector<8x16xf32>
    %c0_131 = arith.constant 0 : index
    %c32_132 = arith.constant 32 : index
    %276 = vector.load %arg20[%c0_131, %c32_132] : memref<8x64xf32, #tpu.memory_space<vmem>>, vector<8x16xf32>
    %c14 = arith.constant 14 : index
    %277 = memref.load %arg15[%c14] : memref<16xf32, #tpu.memory_space<smem>>
    %278 = vector.broadcast %277 : f32 to vector<8x16xf32>
    %279 = arith.mulf %276, %278 : vector<8x16xf32>
    %280 = arith.addf %275, %279 : vector<8x16xf32>
    %c0_133 = arith.constant 0 : index
    %c48_134 = arith.constant 48 : index
    %281 = vector.load %arg20[%c0_133, %c48_134] : memref<8x64xf32, #tpu.memory_space<vmem>>, vector<8x16xf32>
    %c15 = arith.constant 15 : index
    %282 = memref.load %arg15[%c15] : memref<16xf32, #tpu.memory_space<smem>>
    %283 = vector.broadcast %282 : f32 to vector<8x16xf32>
    %284 = arith.mulf %281, %283 : vector<8x16xf32>
    %285 = arith.addf %280, %284 : vector<8x16xf32>
    %c0_135 = arith.constant 0 : index
    %c96 = arith.constant 96 : index
    %286 = vector.load %arg19[%c0_135, %c96] : memref<8x128xf32, #tpu.memory_space<vmem>>, vector<8x16xf32>
    %c0_136 = arith.constant 0 : index
    %c48_137 = arith.constant 48 : index
    %287 = vector.load %arg21[%c0_136, %c48_137] : memref<8x64xf32, #tpu.memory_space<vmem>>, vector<8x16xf32>
    %c3_138 = arith.constant 3 : index
    %288 = memref.load %arg16[%c3_138] : memref<4xf32, #tpu.memory_space<smem>>
    %289 = vector.broadcast %288 : f32 to vector<8x16xf32>
    %290 = arith.addf %285, %289 : vector<8x16xf32>
    %291 = arith.addf %290, %287 : vector<8x16xf32>
    %292 = arith.mulf %291, %286 : vector<8x16xf32>
    %c0_139 = arith.constant 0 : index
    %c48_140 = arith.constant 48 : index
    %293 = vector.load %arg21[%c0_139, %c48_140] : memref<8x64xf32, #tpu.memory_space<vmem>>, vector<8x16xf32>
    tpu.vector_store %arg21[%c0_139, %c48_140], %292 {strides = array<i32>} : memref<8x64xf32, #tpu.memory_space<vmem>>, vector<8x16xf32>,
    %c0_141 = arith.constant 0 : index
    %c0_142 = arith.constant 0 : index
    %294 = vector.load %arg21[%c0_141, %c0_142] : memref<8x64xf32, #tpu.memory_space<vmem>>, vector<8x64xf32>
    %295 = arith.truncf %294 : vector<8x64xf32> to vector<8x64xbf16>
    %c0_143 = arith.constant 0 : index
    %c0_144 = arith.constant 0 : index
    %296 = vector.load %arg13[%c0_143, %c0_144] : memref<64x32xbf16, #tpu.memory_space<vmem>>, vector<64x32xbf16>
    %cst_145 = arith.constant dense<0.000000e+00> : vector<8x32xf32>
    %297 = tpu.matmul %295, %296, %cst_145 {dimension_numbers = #tpu.dot_dimension_numbers<[1], [0], [0], [1], [0, 0, 1, 1], [], []>} : vector<8x64xbf16>, vector<64x32xbf16>, vector<8x32xf32> -> vector<8x32xf32>
    %c0_146 = arith.constant 0 : index
    %c0_147 = arith.constant 0 : index
    %298 = vector.load %arg14[%c0_146, %c0_147] : memref<1x32xf32, #tpu.memory_space<vmem>>, vector<1x32xf32>
    %299 = vector.shape_cast %298 : vector<1x32xf32> to vector<32xf32>
    %300 = vector.shape_cast %299 : vector<32xf32> to vector<1x32xf32>
    %301 = vector.broadcast %300 : vector<1x32xf32> to vector<8x32xf32>
    %302 = arith.addf %297, %301 : vector<8x32xf32>
    %303 = arith.addf %302, %1 : vector<8x32xf32>
    %c0_148 = arith.constant 0 : index
    %c0_149 = arith.constant 0 : index
    %c0_150 = arith.constant 0 : index
    %304 = vector.load %arg17[%c0_148, %c0_149, %c0_150] : memref<1x8x32xf32, #tpu.memory_space<vmem>>, vector<1x8x32xf32>
    %305 = vector.shape_cast %304 : vector<1x8x32xf32> to vector<8x32xf32>
    %306 = vector.shape_cast %303 : vector<8x32xf32> to vector<1x8x32xf32>
    tpu.vector_store %arg17[%c0_148, %c0_149, %c0_150], %306 {strides = array<i32>} : memref<1x8x32xf32, #tpu.memory_space<vmem>>, vector<1x8x32xf32>,
    return
  }
  func.func @transform_0(%arg0: i32, %arg1: i32) -> (i32, i32, i32) {
    %c0_i32 = arith.constant 0 : i32
    %c0_i32_0 = arith.constant 0 : i32
    return %arg0, %arg1, %c0_i32 : i32, i32, i32
  }
  func.func @transform_1(%arg0: i32, %arg1: i32) -> (i32, i32, i32) {
    %c0_i32 = arith.constant 0 : i32
    %c0_i32_0 = arith.constant 0 : i32
    %c0_i32_1 = arith.constant 0 : i32
    return %arg0, %c0_i32, %c0_i32_0 : i32, i32, i32
  }
  func.func @transform_2(%arg0: i32, %arg1: i32) -> (i32, i32, i32) {
    %c0_i32 = arith.constant 0 : i32
    %c0_i32_0 = arith.constant 0 : i32
    %c0_i32_1 = arith.constant 0 : i32
    return %arg0, %c0_i32, %c0_i32_0 : i32, i32, i32
  }
  func.func @transform_3(%arg0: i32, %arg1: i32) -> (i32, i32, i32) {
    %c0_i32 = arith.constant 0 : i32
    %c0_i32_0 = arith.constant 0 : i32
    return %arg0, %arg1, %c0_i32 : i32, i32, i32
  }
  func.func @transform_4(%arg0: i32, %arg1: i32) -> (i32, i32) {
    %c0_i32 = arith.constant 0 : i32
    %c0_i32_0 = arith.constant 0 : i32
    %c0_i32_1 = arith.constant 0 : i32
    return %c0_i32, %c0_i32_0 : i32, i32
  }
  func.func @transform_5(%arg0: i32, %arg1: i32) -> (i32, i32) {
    %c0_i32 = arith.constant 0 : i32
    %c0_i32_0 = arith.constant 0 : i32
    %c0_i32_1 = arith.constant 0 : i32
    return %c0_i32, %c0_i32_0 : i32, i32
  }
  func.func @transform_6(%arg0: i32, %arg1: i32) -> (i32, i32) {
    %c0_i32 = arith.constant 0 : i32
    %c0_i32_0 = arith.constant 0 : i32
    %c0_i32_1 = arith.constant 0 : i32
    return %c0_i32, %c0_i32_0 : i32, i32
  }
  func.func @transform_7(%arg0: i32, %arg1: i32) -> (i32, i32) {
    %c0_i32 = arith.constant 0 : i32
    %c0_i32_0 = arith.constant 0 : i32
    %c0_i32_1 = arith.constant 0 : i32
    return %c0_i32, %c0_i32_0 : i32, i32
  }
  func.func @transform_8(%arg0: i32, %arg1: i32) -> (i32, i32) {
    %c0_i32 = arith.constant 0 : i32
    %c0_i32_0 = arith.constant 0 : i32
    %c0_i32_1 = arith.constant 0 : i32
    return %c0_i32, %c0_i32_0 : i32, i32
  }
  func.func @transform_9(%arg0: i32, %arg1: i32) -> (i32, i32) {
    %c0_i32 = arith.constant 0 : i32
    %c0_i32_0 = arith.constant 0 : i32
    %c0_i32_1 = arith.constant 0 : i32
    return %c0_i32, %c0_i32_0 : i32, i32
  }
  func.func @transform_10(%arg0: i32, %arg1: i32) -> (i32, i32) {
    %c0_i32 = arith.constant 0 : i32
    %c0_i32_0 = arith.constant 0 : i32
    %c0_i32_1 = arith.constant 0 : i32
    return %c0_i32, %c0_i32_0 : i32, i32
  }
  func.func @transform_11(%arg0: i32, %arg1: i32) -> (i32, i32) {
    %c0_i32 = arith.constant 0 : i32
    %c0_i32_0 = arith.constant 0 : i32
    %c0_i32_1 = arith.constant 0 : i32
    return %c0_i32, %c0_i32_0 : i32, i32
  }
  func.func @transform_12(%arg0: i32, %arg1: i32) -> (i32, i32) {
    %c0_i32 = arith.constant 0 : i32
    %c0_i32_0 = arith.constant 0 : i32
    %c0_i32_1 = arith.constant 0 : i32
    return %c0_i32, %c0_i32_0 : i32, i32
  }
  func.func @transform_13(%arg0: i32, %arg1: i32) -> i32 {
    %c0_i32 = arith.constant 0 : i32
    %c0_i32_0 = arith.constant 0 : i32
    return %c0_i32 : i32
  }
  func.func @transform_14(%arg0: i32, %arg1: i32) -> i32 {
    %c0_i32 = arith.constant 0 : i32
    %c0_i32_0 = arith.constant 0 : i32
    return %c0_i32 : i32
  }
  func.func @transform_15(%arg0: i32, %arg1: i32) -> (i32, i32, i32) {
    %c0_i32 = arith.constant 0 : i32
    %c0_i32_0 = arith.constant 0 : i32
    return %arg0, %arg1, %c0_i32 : i32, i32, i32
  }
  func.func @transform_16(%arg0: i32, %arg1: i32) -> (i32, i32, i32, i32) {
    %c0_i32 = arith.constant 0 : i32
    %c0_i32_0 = arith.constant 0 : i32
    %c0_i32_1 = arith.constant 0 : i32
    return %arg0, %c0_i32, %arg1, %c0_i32_0 : i32, i32, i32, i32
  }
}

</mosaic_0001>

<bundles_post_ra>
// kernel: tpu_custom_call.1
= control target key start
LH: loop header
LB: loop body
LE: loop exit
PB: predicated region body
PF: predicated region fallthrough
CT: control target
= control target key end

     0   :  { %s2378_s0 = inlined_call_operand.vmem [shape: bf16[2,8,16], index: 0, kind: input, shape index: {}]   ;;  %s2379_s1 = inlined_call_operand.vmem [shape: bf16[2,8,16], index: 1, kind: input, shape index: {}]   ;;  %s2380_s2 = inlined_call_operand.hbm [shape: bf16[2,8,16], index: 2, kind: input, shape index: {}]   ;;  %s2381_s3 = inlined_call_operand.vmem [shape: f32[2,8,32], index: 3, kind: input, shape index: {}]   ;;  %s2382_s4 = inlined_call_operand.vmem [shape: f32[1,16], index: 4, kind: input, shape index: {}]   ;;  %s2383_s5 = inlined_call_operand.vmem [shape: f32[1,32], index: 5, kind: input, shape index: {}]   ;;  %s2384_s6 = inlined_call_operand.vmem [shape: f32[1,32], index: 6, kind: input, shape index: {}]   ;;  %s2385_s7 = inlined_call_operand.vmem [shape: bf16[32,128], index: 7, kind: input, shape index: {}]   ;;  %s2386_s8 = inlined_call_operand.vmem [shape: f32[1,128], index: 8, kind: input, shape index: {}]   ;;  %s2387_s9 = inlined_call_operand.vmem [shape: f32[1,16], index: 9, kind: input, shape index: {}]   ;;  %s2388_s10 = inlined_call_operand.vmem [shape: f32[1,16], index: 10, kind: input, shape index: {}]   ;;  %s2389_s11 = inlined_call_operand.vmem [shape: bf16[64,32], index: 11, kind: input, shape index: {}]   ;;  %s2390_s12 = inlined_call_operand.vmem [shape: f32[1,32], index: 12, kind: input, shape index: {}]   ;;  %s2391_s13 = inlined_call_operand.vmem [shape: f32[16], index: 13, kind: input, shape index: {}]   ;;  %s2392_s14 = inlined_call_operand.vmem [shape: f32[4], index: 14, kind: input, shape index: {}]   ;;  %s2393_s15 = inlined_call_operand.hbm [shape: f32[2,8,32], index: 15, kind: output, shape index: {0}]   ;;  %s2394_s16 = inlined_call_operand.hbm [shape: f32[2,1,8,8], index: 16, kind: output, shape index: {1}]  }
   0x1   :  { %2403 = sst [smem:[#allocation23_spill]] %s2378_s0 }
   0x2   :  { %2404 = sst [smem:[#allocation24_spill]] %s2379_s1 }
   0x3   :  { %2405 = sst [smem:[#allocation25_spill]] %s2380_s2 }
   0x4   :  { %2406 = sst [smem:[#allocation26_spill]] %s2381_s3 }
   0x5   :  { %2407 = sst [smem:[#allocation27_spill]] %s2382_s4 }
   0x6   :  { %2408 = sst [smem:[#allocation28_spill]] %s2383_s5 }
   0x7   :  { %2409 = sst [smem:[#allocation29_spill]] %s2389_s11 }
   0x8   :  { %2410 = sst [smem:[#allocation30_spill]] %s2390_s12 }
   0x9   :  { %2411 = sst [smem:[#allocation31_spill]] %s2391_s13 }
   0xa   :  { %2412 = sst [smem:[#allocation32_spill]] %s2392_s14 }
   0xb   :  { %2413 = sst [smem:[#allocation33_spill]] %s2393_s15 }
   0xc   :  { %2414 = sst [smem:[#allocation34_spill]] %s2394_s16 }
   0xd   :  { %22 = vsyncpa [#allocation6], 0 }
   0xe   :  { %24 = vsyncpa [#allocation6 + $0x1], 0 }
   0xf   :  { %25 = vsyncpa [#allocation8], 0 }
  0x10   :  { %26 = vsyncpa [#allocation11], 0 }
  0x11   :  { %27 = vsyncpa [#allocation7], 0 }
  0x12   :  { %29 = vsyncpa [#allocation7 + $0x1], 0 }
  0x13   :  { %30 = vsyncpa [#allocation14], 0 }
  0x14   :  { %32 = vsyncpa [#allocation14 + $0x1], 0  ;;  %s1992_s21 = smov 0   ;;  %s1994_s22 = smov 0  }
  0x15   :  { %s1996_s23 = smov 0   ;;  %s1998_s24 = smov 0  }
  0x16   :  { %s2000_s25 = smov 0   ;;  %s2002_s26 = smov 0  }
  0x17 LB: > { %2415 = sst [smem:[#allocation20_spill]] %s1874_s21  ;;  %s1512_s27 = sadd.s32 4294967295, %s1894_s26   ;;  %s1894_s26 = sphi %s2002_s26, %s38_s26   ;;  %s1890_s25 = sphi %s2000_s25, %s2443_s25   ;;  %s1886_s24 = sphi %s1998_s24, %s2442_s24   ;;  %s1882_s23 = sphi %s1996_s23, %s2441_s23   ;;  %s1878_s22 = sphi %s1994_s22, %s2440_s22   ;;  %s1874_s21 = sphi %s1992_s21, %s2439_s21  }
  0x18   : > { %s1513_s28 = sadd.s32 4294967294, %s1894_s26   ;;  %p124_p0 = scmp.ne.s32.totalorder %s1878_s22, %s1874_s21 }
  0x19   : > { %p2026_p1 = scmp.eq.s32.totalorder %s1512_s27, 0  ;;  %p415_p2 = scmp.eq.s32.totalorder %s1513_s28, 1 }
  0x1a   : > { %p1514_p4 = scmp.ge.s32.totalorder %s1894_s26, 1  ;;  %p450_p6 = scmp.lt.s32.totalorder %s1894_s26, 3 }
  0x1b   : > { %p2032_p3 = por %p2026_p1, %p124_p0  ;;  %p2037_p5 = por %p415_p2, %p124_p0 }
  0x1c   : > { %s2420_s13 = sld [smem:[#allocation31_spill]]  ;;  %p2045_p7 = pnand %p1514_p4, %p450_p6 }
  0x1d   : > { %s2418_s0 = scalar_select %p2037_p5, 1, 0 }
  0x1e   : > { %p1517_p8 = scmp.ge.s32.totalorder %s1894_s26, 2  ;;  %p1602_p9 = pneg %p2045_p7 }
  0x1f   : > { %2419 = sst [smem:[#allocation21_spill]] %s2418_s0  ;;  %s1896_s17 = smov [#allocation9]  }
  0x20   : > { %s2422_s14 = sld [smem:[#allocation32_spill]]  ;;  %p1603_p10 = pnand %p1602_p9, %p2026_p1 }
  0x21   : > { %s1897_s18 = smov [#allocation10]   ;;  %p409_p11 = scmp.eq.s32.totalorder %s1512_s27, 1 }
  0x22   : > { %s489_s19 = sshll.u32 %s2420_s13, 4  ;;  %s50_s13 = sadd.s32 1, %s1890_s25  ;;  %s490_s19 = int_to_ptr.vmem [resolvable:$true] %s489_s19 }
  0x23   : > { %1605 = dma.vmem_to_smem (!%p1603_p10), %s490_s19, 16, %s1896_s17, [#allocation8]  }
  0x24   : > { %p52_p12 = scmp.ge.s32.totalorder %s50_s13, 2  ;;  %s111_s15 = sadd.s32 1, %s1882_s23 }
  0x25   : > { %p118_p13 = scmp.ne.s32.totalorder %s1882_s23, %s1878_s22  ;;  %p119_p0 = scmp.eq.s32.totalorder %s1894_s26, 0 }
  0x26   : > { %s499_s21 = sshll.u32 %s2422_s14, 4  ;;  %s2445_s13 = smov (%p52_p12, %s50_s13), 0  ;;  %s500_s21 = int_to_ptr.vmem [resolvable:$true] %s499_s21 }
  0x27   : > { %1608 = dma.vmem_to_smem (!%p1603_p10), %s500_s21, 16, %s1897_s18, [#allocation11]  }
  0x28   : > { %p2064_p2 = por %p409_p11, %p118_p13  ;;  %p1622_p4 = scmp.lt.s32.totalorder %s1894_s26, 2 }
  0x29   : > { %s108_s19 = ssub.s32 %s1890_s25, %s2445_s13  ;;  %s527_s28 = sand.u32 1, %s1882_s23  }
  0x2a   : > { %s2423_s0 = scalar_select %p2064_p2, 1, 0 }
  0x2b   : > { %p109_p6 = scmp.eq.s32.totalorder %s108_s19, 0  ;;  %p120_p9 = por %p119_p0, %p118_p13 }
  0x2c   : > { %2424 = sst [smem:[#allocation22_spill]] %s2423_s0  ;;  %s1518_s21 = sshll.u32 %s527_s28, 2 }
  0x2d   : > { %s1519_s27 = sshll.u32 %s1890_s25, 2  ;;  %s2425_s2 = sld [smem:[#allocation25_spill]] }
  0x2e   : > { %s2074_s17 = scalar_select %p109_p6, %s1882_s23, %s111_s15  }
  0x2f   : > { %s531_s11 = scalar_lea.vmem [#allocation5], %s1518_s21  ;;  %p1610_p10 = pnand %p1622_p4, %p120_p9 }
  0x30   : > { %s539_s4 = sshll.u32 %s531_s11, 4  ;;  %s528_s0 = scalar_lea.sflag [#allocation6], %s527_s28  ;;  %s540_s4 = int_to_ptr.vmem [resolvable:$true] %s539_s4 }
  0x31   : > { %558 = sbr.rel (%p2045_p7) target bundleno = 2179 (0x883), region = 80  ;;  %s2084_s15 = sand.u32 (!%p2045_p7), 1, %s1878_s22  }
  0x32   : > { %s1521_s14 = sshll.u32 (!%p2045_p7), %s2084_s15, 2  ;;  %s561_s19 = scalar_lea.sflag (!%p2045_p7), [#allocation6], %s2084_s15 }
  0x33   : > { %s535_s12 = scalar_lea.hbm %s2425_s2, %s1519_s27 }
  0x34   : > { %s537_s16 = sshll.u32 %s535_s12, 4  ;;  %s2088_s12 = scalar_lea.vmem (!%p2045_p7), [#allocation5], %s1521_s14  ;;  %s538_s16 = int_to_ptr.hbm [resolvable:$true] %s537_s16 }
  0x35   : > { %1612 = dma.hbm_to_vmem [thread:$0]  (!%p1610_p10), %s538_s16, 64, %s540_s4, %s528_s0  }
  0x36   : > { %1853 = dma.done.wait (%p2032_p3), %s561_s19, 64  }
  0x37   : > { %1855 = vsyncadd (%p2032_p3), %s561_s19, 4294967232 }
  0x38   : > { %1857 = dma.done.wait (%p2026_p1), [#allocation8], 16  }
  0x39   : > { %1859 = vsyncadd (%p2026_p1), [#allocation8], 4294967280 }
  0x3a   : > { %1861 = dma.done.wait (%p2026_p1), [#allocation11], 16  }
  0x3b   : > { %1863 = vsyncadd (%p2026_p1), [#allocation11], 4294967280 }
  0x3c   : > { %580 = sfence }
  0x3d   : > { %p648_p7 = scmp.lt.s32.totalorder %s1886_s24, 1  ;;  %vm752_vm0 = vcmask 261120   ;;  %s2426_s3 = sld [smem:[#allocation26_spill]]  ;;  %v1898_v2 = vmov 32.0   ;;  %vm673_vm2 = vcmask 130048   ;;  %v1583_v16 = vld [vmem:[%s2385_s7 + $0x8] sm:$0xff] }
  0x3e   : > { %1692 = vrcp.f32 %v1898_v2  ;;  %s2427_s1 = sld [smem:[#allocation24_spill]]  ;;  %820 = vmatpush.bf16.msra.mxu2 %v1583_v16  ;;  %v1582_v18 = vld [vmem:[%s2385_s7] sm:$0xff]  ;;  %vm693_vm6 = vcmask 64512   ;;  %s1902_s30 = smov 80  }
  0x3f   : > { %s2104_s4 = scalar_select %p648_p7, %s1886_s24, 1  ;;  %v1686_v31 = vld [vmem:[%s2384_s6] ss:$0 sm:$0xff] }
  0x40   : > { %s2428_s14 = sld [smem:[#allocation23_spill]]  ;;  %v1687_v38 = vld [vmem:[%s2386_s8] ss:$0 sm:$0xff]  ;;  %s1904_s0 = smov 96  }
  0x41   : > { %s1528_s11 = sshll.u32 %s2104_s4, 3  ;;  %s1526_s29 = sshll.u32 %s2104_s4, 2 }
  0x42   : > { %821 = vmatpush.bf16.msra.mxu2 %v1582_v18  ;;  %s2429_s5 = sld [smem:[#allocation28_spill]]  ;;  %s1905_s28 = smov 64  }
  0x43   : > { %s665_s20 = scalar_lea.vmem %s2426_s3, %s1528_s11  ;;  %s1900_s11 = smov 112  }
  0x44   : > { %v2110_v0 = vld [vmem:[%s665_s20] sm:$0xff]  ;;  %v1693_v3 = vpop.eup %1692  ;;  %s658_s21 = scalar_lea.vmem %s2427_s1, %s1526_s29  ;;  %s2430_s16 = sld [smem:[#allocation27_spill]] }
  0x45   : > { %v753_v1 = vsel %vm752_vm0, %v2110_v0, 0.0  ;;  %v757_v4 = vmul.f32 32.0, %v1693_v3  ;;  %vm761_vm1 = vweird.f32 %v1693_v3  ;;  %v672_v14 = vld [vmem:[%s658_s21] sm:$0xf]  ;;  %s2402_s21 = sshll.u32 %s2084_s15, 3  ;;  %s1906_s4 = smov 32  }
  0x46   : > { %754 = vadd.xlane.f32.xlu0 %v753_v1  ;;  %v678_v15 = vsel %vm673_vm2, %v672_v14, 0  ;;  %s654_s19 = scalar_lea.vmem %s2428_s14, %s1526_s29  ;;  %s2145_s27 = scalar_lea.vmem [#allocation13], %s2402_s21  ;;  %v668_v14 = vld [vmem:[%s2088_s12] sm:$0xf] }
  0x47   : > { %v758_v5 = vsub.f32 1.0, %v757_v4  ;;  %687 = vmatpush.bf16.xpose.msra.mxu0 %v678_v15  ;;  %v671_v17 = vld [vmem:[%s654_s19] sm:$0xf]  ;;  %v669_v16 = vunpack.c.l.bf16 %v668_v14  ;;  %s1899_s19 = smov 48   ;;  %s1901_s12 = smov 16  }
  0x48   : > { %v1685_v28 = vld [vmem:[%s2429_s5] ss:$0 sm:$0xff]  ;;  %s1545_s20 = sld [smem:[#allocation9 + $0x5]] }
  0x49   : > { %v759_v6 = vmul.f32 %v1693_v3, %v758_v5  ;;  %723 = vmatpush.msra.mxu1 %v669_v16  ;;  %s1542_s29 = sld [smem:[#allocation9 + $0x2]] }
  0x4a   : > { %s1541_s18 = sld [smem:[#allocation9 + $0x1]] }
  0x4b   : > { %v760_v7 = vadd.f32 %v1693_v3, %v759_v6  ;;  %s1551_s14 = sld [smem:[#allocation9 + $0xa]] }
  0x4c   : > { %s1543_s21 = sld [smem:[#allocation9 + $0x3]] }
  0x4d   : > { %v762_v8 = vsel %vm761_vm1, %v1693_v3, %v760_v7 }
  0x4e   : > { %1529 = vmatmul.msk.bf16.vlgmr.msra.gmra.mxu0 %vm673_vm2, %v671_v17 }
  0xb9   : > { %v755_v9 = vpop.xlane.xlu0 %754 }
  0xba   : > { %v763_v10 = vmul.f32 %v762_v8, %v755_v9 }
  0xbc   : > { %v764_v11 = vsub.f32 %v2110_v0, %v763_v10 }
  0xbe   : > { %v765_v12 = vmul.f32 %v764_v11, %v764_v11 }
  0xc0   : > { %v766_v13 = vsel %vm752_vm0, %v765_v12, 0.0 }
  0xc1   : > { %767 = vadd.xlane.f32.xlu0 %v766_v13 }
  0xcb   : > { %v2138_v35 = vpop.f32.mrf.mxu0 }
  0xcc   : > { %v695_v36 = vsel %vm693_vm6, %v2138_v35, -inf  ;;  %694 = vst.msk [vmem:[%s2145_s27] sm:$0xff] %vm693_vm6, %v2138_v35 }
  0xcd   : > { %696 = vmax.xlane.f32.xlu0 %v695_v36 }
  0xd3   : > { %v691_v37 = vpop.f32.mrf.mxu0 }
 0x134   : > { %v768_v19 = vpop.xlane.xlu0 %767 }
 0x135   : > { %v769_v20 = vmul.f32 %v768_v19, %v762_v8 }
 0x137   : > { %v770_v21 = vadd.f32 1e-05, %v769_v20  ;;  %v2163_v20 = vld [vmem:[%s2387_s9] ss:$0 sm:$0xff] }
 0x138   : > { %914 = vrot.lane.b32.xlu0 %v2163_v20, %s1901_s12 }
 0x139   : > { %1694 = vrsqrt.f32 %v770_v21  ;;  %vm777_vm4 = vweird.f32 %v770_v21 }
 0x13f   : > { %v1695_v22 = vpop.eup %1694 }
 0x140   : > { %v772_v23 = vmul.f32 %v1695_v22, %v770_v21  ;;  %vm778_vm3 = vweird.f32 %v1695_v22  ;;  %v697_v21 = vpop.xlane.xlu0 %696 }
 0x141   : > { %vm779_vm5 = vmor %vm777_vm4, %vm778_vm3 }
 0x142   : > { %v773_v24 = vmul.f32 %v1695_v22, %v772_v23 }
 0x144   : > { %v774_v25 = vmul.f32 0.5, %v773_v24 }
 0x146   : > { %v775_v26 = vsub.f32 1.5, %v774_v25 }
 0x148   : > { %v776_v27 = vmul.f32 %v1695_v22, %v775_v26 }
 0x14a   : > { %v780_v29 = vsel %vm779_vm5, %v1695_v22, %v776_v27  ;;  %v698_v22 = vsub.f32 %v2138_v35, %v697_v21 }
 0x14b   : > { %v781_v30 = vmul.f32 %v780_v29, %v764_v11 }
 0x14c   : > { %v699_v23 = vmul.f32 1.442695, %v698_v22 }
 0x14d   : > { %v785_v32 = vmul.f32 %v1685_v28, %v781_v30 }
 0x14f   : > { %v789_v33 = vadd.f32 %v1686_v31, %v785_v32 }
 0x151   : > { %v790_v34 = vpack.c.bf16 %v789_v33, %v789_v33  ;;  %v1689_v33 = vld [vmem:[%s2388_s10] ss:$0 sm:$0xff] }
 0x153   : > { %1539 = vmatmul.msk.bf16.vlgmr.msra.gmra.mxu2 %vm752_vm0, %v790_v34  ;;  %v1903_v34 = vmov 16.0  }
 0x1d6   : > { %v823_v39 = vpop.f32.mrf.mxu2 }
 0x1d7   : > { %v824_v40 = vadd.f32 %v1687_v38, %v823_v39 }
 0x1d9   : > { %v828_v41 = vmul.f32 0.70710677, %v824_v40  ;;  %v827_v17 = vmul.f32 0.5, %v824_v40 }
 0x1db   : > { %v829_v42 = vmul.f32 %v828_v41, %v828_v41 }
 0x1dd   : > { %v830_v43 = vmin.f32 %v829_v42, 16.0 }
 0x1de   : > { %v825_v44 = vpop.f32.mrf.mxu2 }
 0x1df   : > { %v831_v45 = vmul.f32 2.1237322e-06, %v830_v43  ;;  %v842_v46 = vmul.f32 3.8918573e-05, %v830_v43 }
 0x1e1   : > { %v832_v47 = vadd.f32 0.00028619796, %v831_v45  ;;  %v843_v48 = vadd.f32 0.001143296, %v842_v46  ;;  %v2193_v45 = vpop.permute.xlu0 %914 }
 0x1e3   : > { %v833_v49 = vmul.f32 %v832_v47, %v830_v43  ;;  %v844_v50 = vmul.f32 %v843_v48, %v830_v43 }
 0x1e5   : > { %v845_v51 = vadd.f32 0.014752088, %v844_v50  ;;  %v834_v52 = vadd.f32 0.0036580483, %v833_v49 }
 0x1e7   : > { %v846_v53 = vmul.f32 %v845_v51, %v830_v43  ;;  %v835_v55 = vmul.f32 %v834_v52, %v830_v43 }
 0x1e9   : > { %v847_v54 = vadd.f32 0.112945676, %v846_v53  ;;  %v836_v58 = vadd.f32 0.05243302, %v835_v55 }
 0x1eb   : > { %v848_v56 = vmul.f32 %v847_v54, %v830_v43  ;;  %v837_v61 = vmul.f32 %v836_v58, %v830_v43 }
 0x1ed   : > { %v849_v57 = vadd.f32 0.4994258, %v848_v56  ;;  %v838_v62 = vadd.f32 0.18741608, %v837_v61 }
 0x1ef   : > { %v850_v59 = vmul.f32 %v849_v57, %v830_v43  ;;  %v839_v1 = vmul.f32 %v838_v62, %v830_v43 }
 0x1f1   : > { %v851_v60 = vadd.f32 1.0, %v850_v59  ;;  %v840_v5 = vadd.f32 1.1283791, %v839_v1 }
 0x1f3   : > { %1696 = vrcp.f32 %v851_v60  ;;  %v863_v4 = vand.u32 2147483648, %v851_v60  ;;  %v861_v7 = vand.u32 2147483647, %v851_v60  ;;  %vm857_vm8 = vweird.f32 %v851_v60 }
 0x1f4   : > { %v841_v10 = vmul.f32 %v840_v5, %v828_v41  ;;  %1698 = vpow2.f32 %v699_v23 }
 0x1f5   : > { %v864_v9 = vor.u32 1.1754944e-38, %v863_v4  ;;  %vm862_vm10 = vcmp.eq.f32.partialorder %v861_v7, 8.507059e+37  ;;  %1700 = vrcp.f32 %v1903_v34 }
 0x1f9   : > { %v1697_v63 = vpop.eup %1696 }
 0x1fa   : > { %v853_v2 = vmul.f32 %v1697_v63, %v851_v60  ;;  %vm858_vm7 = vweird.f32 %v1697_v63  ;;  %v2172_v24 = vpop.eup %1698 }
 0x1fb   : > { %vm859_vm9 = vmor %vm857_vm8, %vm858_vm7  ;;  %1530 = vmatmul.msk.f32.vlgmr.msra.gmra.mxu1 %vm693_vm6, %v2172_v24  ;;  %v1701_v35 = vpop.eup %1700 }
 0x1fc   : > { %v854_v3 = vsub.f32 1.0, %v853_v2  ;;  %v883_v36 = vmul.f32 16.0, %v1701_v35  ;;  %vm887_vm11 = vweird.f32 %v1701_v35 }
 0x1fe   : > { %v855_v6 = vmul.f32 %v1697_v63, %v854_v3  ;;  %v884_v37 = vsub.f32 1.0, %v883_v36 }
 0x200   : > { %v856_v8 = vadd.f32 %v1697_v63, %v855_v6  ;;  %v885_v38 = vmul.f32 %v1701_v35, %v884_v37  ;;  %v701_v6 = vsel %vm693_vm6, %v2172_v24, 0.0 }
 0x202   : > { %v860_v11 = vsel %vm859_vm9, %v1697_v63, %v856_v8  ;;  %v886_v39 = vadd.f32 %v1701_v35, %v885_v38 }
 0x203   : > { %v865_v12 = vsel %vm862_vm10, %v864_v9, %v860_v11  ;;  %vm738_vm10 = vcmask 261248  }
 0x204   : > { %v866_v13 = vmul.f32 %v865_v12, %v841_v10  ;;  %v2184_v40 = vsel %vm887_vm11, %v1701_v35, %v886_v39  ;;  %vm743_vm11 = vcmask 392448  }
 0x206   : > { %v1540_v15 = vclamps-f32 %v866_v13, 1.0 }
 0x208   : > { %v869_v18 = vadd.f32 1.0, %v1540_v15 }
 0x20a   : > { %v2154_v19 = vmul.f32 %v869_v18, %v827_v17 }
 0x20c   : > { %975 = vrot.lane.b32.xlu2 %v2154_v19, %s1899_s19  ;;  %876 = vrot.lane.b32.xlu1 %v2154_v19, %s1900_s11 }
 0x214   : > { %1019 = vrot.lane.b32.xlu2 %v2154_v19, %s1901_s12  ;;  %931 = vrot.lane.b32.xlu1 %v2154_v19, %s1902_s30 }
 0x266   : > { %v976_v25 = vpop.permute.xlu2 %975 }
 0x267   : > { %v978_v26 = vsel %vm673_vm2, %v976_v25, 0.0 }
 0x268   : > { %979 = vadd.xlane.f32.xlu2 %v978_v26 }
 0x26e   : > { %v1020_v29 = vpop.permute.xlu2 %1019 }
 0x26f   : > { %v1022_v32 = vsel %vm673_vm2, %v1020_v29, 0.0 }
 0x27e   : > { %v877_v27 = vpop.permute.xlu1 %876 }
 0x27f   : > { %v879_v28 = vsel %vm673_vm2, %v877_v27, 0.0 }
 0x280   : > { %880 = vadd.xlane.f32.xlu0 %v879_v28 }
 0x286   : > { %v932_v30 = vpop.permute.xlu1 %931 }
 0x287   : > { %v934_v31 = vsel %vm673_vm2, %v932_v30, 0.0 }
 0x288   : > { %935 = vadd.xlane.f32.xlu1 %v934_v31  ;;  %1023 = vadd.xlane.f32.xlu0 %v1022_v32 }
 0x2a1   : > { %920 = vrot.lane.b32.xlu1 %v1689_v33, %s1901_s12 }
 0x2db   : > { %v980_v41 = vpop.xlane.xlu2 %979 }
 0x2dc   : > { %v981_v42 = vmul.f32 %v980_v41, %v2184_v40 }
 0x2de   : > { %v2188_v43 = vsub.f32 %v2154_v19, %v981_v42 }
 0x2e0   : > { %v983_v44 = vmul.f32 %v2188_v43, %v2188_v43 }
 0x2e2   : > { %985 = vrot.lane.b32.xlu1 %v983_v44, %s1899_s19 }
 0x2f3   : > { %v881_v46 = vpop.xlane.xlu0 %880 }
 0x2f4   : > { %v889_v47 = vmul.f32 %v2184_v40, %v881_v46 }
 0x2f6   : > { %v2197_v48 = vsub.f32 %v2154_v19, %v889_v47 }
 0x2f8   : > { %v891_v49 = vmul.f32 %v2197_v48, %v2197_v48 }
 0x2fa   : > { %893 = vrot.lane.b32.xlu0 %v891_v49, %s1900_s11 }
 0x2fb   : > { %v936_v50 = vpop.xlane.xlu1 %935  ;;  %v1024_v54 = vpop.xlane.xlu0 %1023 }
 0x2fc   : > { %v937_v51 = vmul.f32 %v936_v50, %v2184_v40  ;;  %v1025_v55 = vmul.f32 %v1024_v54, %v2184_v40 }
 0x2fe   : > { %v938_v52 = vsub.f32 %v2154_v19, %v937_v51  ;;  %v2212_v56 = vsub.f32 %v2154_v19, %v1025_v55 }
 0x300   : > { %v939_v53 = vmul.f32 %v938_v52, %v938_v52  ;;  %v1027_v57 = vmul.f32 %v2212_v56, %v2212_v56 }
 0x302   : > { %941 = vrot.lane.b32.xlu2 %v939_v53, %s1902_s30  ;;  %1004 = vrot.lane.b32.xlu0 %v2163_v20, %s1902_s30 }
 0x30a   : > { %964 = vrot.lane.b32.xlu0 %v1689_v33, %s1899_s19  ;;  %960 = vrot.lane.b32.xlu2 %v2163_v20, %s1899_s19 }
 0x312   : > { %1029 = vrot.lane.b32.xlu0 %v1027_v57, %s1901_s12 }
 0x313   : > { %v2217_v58 = vpop.permute.xlu1 %920 }
 0x354   : > { %v986_v59 = vpop.permute.xlu1 %985 }
 0x355   : > { %v988_v60 = vsel %vm673_vm2, %v986_v59, 0.0 }
 0x356   : > { %989 = vadd.xlane.f32.xlu1 %v988_v60 }
 0x35c   : > { %v942_v61 = vpop.permute.xlu2 %941 }
 0x35d   : > { %v944_v62 = vsel %vm673_vm2, %v942_v61, 0.0 }
 0x35e   : > { %945 = vadd.xlane.f32.xlu2 %v944_v62 }
 0x364   : > { %v961_v7 = vpop.permute.xlu2 %960 }
 0x36c   : > { %v894_v63 = vpop.permute.xlu0 %893 }
 0x36d   : > { %v896_v1 = vsel %vm673_vm2, %v894_v63, 0.0 }
 0x36e   : > { %897 = vadd.xlane.f32.xlu0 %v896_v1 }
 0x36f   : > { %1008 = vrot.lane.b32.xlu1 %v1689_v33, %s1902_s30 }
 0x374   : > { %v2223_v2 = vpop.permute.xlu0 %1004 }
 0x376   : > { %1048 = vrot.lane.b32.xlu2 %v2163_v20, %s1900_s11 }
 0x37c   : > { %v965_v3 = vpop.permute.xlu0 %964 }
 0x384   : > { %v1030_v4 = vpop.permute.xlu0 %1029 }
 0x385   : > { %v1032_v5 = vsel %vm673_vm2, %v1030_v4, 0.0 }
 0x386   : > { %1033 = vadd.xlane.f32.xlu0 %v1032_v5  ;;  %v725_v5 = vpop.f32.mrf.mxu1 }
 0x39a   : > { %1052 = vrot.lane.b32.xlu0 %v1689_v33, %s1900_s11 }
 0x39f   : > { %702 = vadd.xlane.f32.xlu2 %v701_v6 }
 0x3c9   : > { %v990_v8 = vpop.xlane.xlu1 %989 }
 0x3ca   : > { %v991_v11 = vmul.f32 %v990_v8, %v2184_v40 }
 0x3cc   : > { %v992_v13 = vadd.f32 1e-05, %v991_v11  ;;  %v1102_v11 = vstv %s1545_s20  ;;  %s1547_s20 = sld [smem:[#allocation9 + $0x7]] }
 0x3ce   : > { %vm999_vm5 = vweird.f32 %v992_v13 }
 0x3d1   : > { %v946_v9 = vpop.xlane.xlu2 %945 }
 0x3d2   : > { %v947_v10 = vmul.f32 %v946_v9, %v2184_v40 }
 0x3d4   : > { %v948_v12 = vadd.f32 1e-05, %v947_v10 }
 0x3d6   : > { %1702 = vrsqrt.f32 %v948_v12  ;;  %vm955_vm13 = vweird.f32 %v948_v12 }
 0x3d7   : > { %1704 = vrsqrt.f32 %v992_v13 }
 0x3dc   : > { %v1703_v14 = vpop.eup %1702 }
 0x3dd   : > { %v950_v15 = vmul.f32 %v1703_v14, %v948_v12  ;;  %v1705_v20 = vpop.eup %1704  ;;  %vm956_vm12 = vweird.f32 %v1703_v14  ;;  %v1074_v12 = vstv %s1542_s29  ;;  %s1556_s29 = sld [smem:[#allocation9 + $0xe]] }
 0x3de   : > { %v994_v24 = vmul.f32 %v1705_v20, %v992_v13  ;;  %vm957_vm14 = vmor %vm955_vm13, %vm956_vm12  ;;  %vm1000_vm1 = vweird.f32 %v1705_v20  ;;  %vm748_vm12 = vcmask 523648   ;;  %v1066_v13 = vstv %s1541_s18  ;;  %s1091_s18 = sld [smem:[#allocation10]] }
 0x3df   : > { %v951_v16 = vmul.f32 %v1703_v14, %v950_v15  ;;  %vm1001_vm6 = vmor %vm999_vm5, %vm1000_vm1 }
 0x3e0   : > { %v995_v28 = vmul.f32 %v1705_v20, %v994_v24 }
 0x3e1   : > { %v952_v17 = vmul.f32 0.5, %v951_v16  ;;  %v898_v18 = vpop.xlane.xlu0 %897  ;;  %v1009_v54 = vpop.permute.xlu1 %1008 }
 0x3e2   : > { %v899_v21 = vmul.f32 %v898_v18, %v2184_v40  ;;  %v996_v32 = vmul.f32 0.5, %v995_v28  ;;  %v1118_v28 = vstv %s1547_s20  ;;  %s1552_s20 = sld [smem:[#allocation9 + $0xb]] }
 0x3e3   : > { %v953_v22 = vsub.f32 1.5, %v952_v17 }
 0x3e4   : > { %v900_v23 = vadd.f32 1e-05, %v899_v21  ;;  %v997_v35 = vsub.f32 1.5, %v996_v32  ;;  %v1158_v21 = vstv %s1551_s14  ;;  %s1544_s14 = sld [smem:[#allocation9 + $0x4]] }
 0x3e5   : > { %v954_v25 = vmul.f32 %v1703_v14, %v953_v22 }
 0x3e6   : > { %1706 = vrsqrt.f32 %v900_v23  ;;  %vm907_vm3 = vweird.f32 %v900_v23  ;;  %v998_v39 = vmul.f32 %v1705_v20, %v997_v35 }
 0x3e7   : > { %v958_v26 = vsel %vm957_vm14, %v1703_v14, %v954_v25 }
 0x3e8   : > { %v959_v27 = vmul.f32 %v958_v26, %v938_v52  ;;  %v1002_v44 = vsel %vm1001_vm6, %v1705_v20, %v998_v39 }
 0x3e9   : > { %v1003_v50 = vmul.f32 %v1002_v44, %v2188_v43 }
 0x3ea   : > { %v963_v29 = vmul.f32 %v961_v7, %v959_v27 }
 0x3eb   : > { %v1007_v53 = vmul.f32 %v2223_v2, %v1003_v50 }
 0x3ec   : > { %v1707_v30 = vpop.eup %1706  ;;  %v967_v31 = vadd.f32 %v965_v3, %v963_v29  ;;  %v1690_v3 = vld [vmem:[%s2430_s16] ss:$0 sm:$0xff]  ;;  %s1546_s16 = sld [smem:[#allocation9 + $0x6]] }
 0x3ed   : > { %v902_v33 = vmul.f32 %v1707_v30, %v900_v23  ;;  %vm908_vm15 = vweird.f32 %v1707_v30  ;;  %v1011_v57 = vadd.f32 %v1009_v54, %v1007_v53  ;;  %v1082_v23 = vstv %s1543_s21  ;;  %s1550_s21 = sld [smem:[#allocation9 + $0x9]] }
 0x3ee   : > { %969 = vrot.lane.b32.xlu0 %v967_v31, %s1904_s0  ;;  %vm909_vm4 = vmor %vm907_vm3, %vm908_vm15 }
 0x3ef   : > { %v903_v34 = vmul.f32 %v1707_v30, %v902_v33 }
 0x3f1   : > { %v904_v36 = vmul.f32 0.5, %v903_v34 }
 0x3f2   : > { %v1110_v22 = vstv %s1546_s16  ;;  %s1548_s16 = sld [smem:[#allocation10 + $0x1]] }
 0x3f3   : > { %v905_v37 = vsub.f32 1.5, %v904_v36  ;;  %v1150_v32 = vstv %s1550_s21  ;;  %s1549_s21 = sld [smem:[#allocation9 + $0x8]] }
 0x3f5   : > { %v906_v38 = vmul.f32 %v1707_v30, %v905_v37 }
 0x3f7   : > { %v910_v41 = vsel %vm909_vm4, %v1707_v30, %v906_v38  ;;  %v1206_v30 = vstv %s1556_s29  ;;  %s1555_s29 = sld [smem:[#allocation9 + $0xd]] }
 0x3f8   : > { %v911_v42 = vmul.f32 %v910_v41, %v2197_v48  ;;  %v1092_v41 = vstv %s1091_s18  ;;  %s2431_s18 = sld [smem:[#allocation29_spill]] }
 0x3f9   : > { %v1034_v46 = vpop.xlane.xlu0 %1033 }
 0x3fa   : > { %v1035_v47 = vmul.f32 %v1034_v46, %v2184_v40  ;;  %v917_v49 = vmul.f32 %v2193_v45, %v911_v42  ;;  %v1049_v40 = vpop.permute.xlu2 %1048 }
 0x3fc   : > { %v1036_v51 = vadd.f32 1e-05, %v1035_v47  ;;  %v923_v52 = vadd.f32 %v2217_v58, %v917_v49 }
 0x3fe   : > { %1708 = vrsqrt.f32 %v1036_v51  ;;  %925 = vrot.lane.b32.xlu1 %v923_v52, %s1900_s11  ;;  %vm1043_vm8 = vweird.f32 %v1036_v51  ;;  %v1099_v52 = vstv %s1544_s14  ;;  %s2433_s14 = sld [smem:[#allocation34_spill]] }
 0x404   : > { %v1709_v55 = vpop.eup %1708 }
 0x405   : > { %v1038_v48 = vmul.f32 %v1709_v55, %v1036_v51  ;;  %vm1044_vm7 = vweird.f32 %v1709_v55 }
 0x406   : > { %1013 = vrot.lane.b32.xlu1 %v1011_v57, %s1902_s30  ;;  %vm1045_vm9 = vmor %vm1043_vm8, %vm1044_vm7 }
 0x407   : > { %v1039_v59 = vmul.f32 %v1709_v55, %v1038_v48 }
 0x409   : > { %v1040_v60 = vmul.f32 0.5, %v1039_v59 }
 0x40b   : > { %v1041_v45 = vsub.f32 1.5, %v1040_v60  ;;  %v1128_v60 = vstv %s1548_s16 }
 0x40c   : > { %v1053_v62 = vpop.permute.xlu0 %1052 }
 0x40d   : > { %v1042_v43 = vmul.f32 %v1709_v55, %v1041_v45 }
 0x40f   : > { %v1046_v58 = vsel %vm1045_vm9, %v1709_v55, %v1042_v43 }
 0x410   : > { %v1047_v61 = vmul.f32 %v1046_v58, %v2212_v56 }
 0x412   : > { %v1051_v63 = vmul.f32 %v1049_v40, %v1047_v61  ;;  %v703_v1 = vpop.xlane.xlu2 %702 }
 0x413   : > { %1710 = vrcp.f32 %v703_v1 }
 0x414   : > { %v1055_v2 = vadd.f32 %v1053_v62, %v1051_v63  ;;  %v1166_v62 = vstv %s1552_s20  ;;  %s1558_s20 = sld [smem:[#allocation10 + $0x3]] }
 0x416   : > { %1057 = vrot.lane.b32.xlu0 %v1055_v2, %s1905_s28 }
 0x419   : > { %v1711_v4 = vpop.eup %1710 }
 0x41a   : > { %v728_v6 = vmul.f32 %v1711_v4, %v725_v5  ;;  %v1147_v5 = vstv %s1549_s21 }
 0x41c   : > { %v732_v7 = vadd.f32 %v1690_v3, %v728_v6  ;;  %v1198_v3 = vstv %s1555_s29 }
 0x41e   : > { %735 = vrot.lane.b32.xlu1 %v732_v7, %s1901_s12  ;;  %733 = vst.msk [vmem:[#allocation4] sm:$0xff] %vm673_vm2, %v732_v7  ;;  %740 = vrot.lane.b32.xlu0 %v732_v7, %s1906_s4 }
 0x426   : > { %745 = vrot.lane.b32.xlu1 %v732_v7, %s1899_s19 }
 0x460   : > { %v970_v8 = vpop.permute.xlu0 %969 }
 0x470   : > { %v926_v56 = vpop.permute.xlu1 %925 }
 0x471   : > { %928 = vst.msk [vmem:[#allocation3] sm:$0xff] %vm673_vm2, %v926_v56 }
 0x472   : > { %972 = vst.msk [vmem:[#allocation3] sm:$0xff] %vm738_vm10, %v970_v8 }
 0x478   : > { %v1014_v9 = vpop.permute.xlu1 %1013 }
 0x479   : > { %1016 = vst.msk [vmem:[#allocation3] sm:$0xff] %vm743_vm11, %v1014_v9 }
 0x488   : > { %v1058_v10 = vpop.permute.xlu0 %1057 }
 0x489   : > { %1060 = vst.msk [vmem:[#allocation3] sm:$0xff] %vm748_vm12, %v1058_v10 }
 0x490   : > { %v736_v14 = vpop.permute.xlu1 %735  ;;  %v741_v15 = vpop.permute.xlu0 %740  ;;  %v2256_v16 = vld [vmem:[#allocation3] sm:$0xff] }
 0x491   : > { %739 = vst.msk [vmem:[#allocation4] sm:$0xff] %vm738_vm10, %v736_v14  ;;  %v1103_v17 = vmul.f32 %v1102_v11, %v2256_v16  ;;  %v1075_v18 = vmul.f32 %v2256_v16, %v1074_v12  ;;  %v1067_v20 = vmul.f32 %v2256_v16, %v1066_v13  ;;  %v1159_v25 = vmul.f32 %v1158_v21, %v2256_v16 }
 0x492   : > { %744 = vst.msk [vmem:[#allocation4] sm:$0xff] %vm743_vm11, %v741_v15  ;;  %v1111_v26 = vmul.f32 %v1110_v22, %v2256_v16  ;;  %v1083_v27 = vmul.f32 %v2256_v16, %v1082_v23  ;;  %v1119_v29 = vmul.f32 %v1118_v28, %v2256_v16  ;;  %v1207_v31 = vmul.f32 %v1206_v30, %v2256_v16 }
 0x493   : > { %1105 = vrot.lane.b32.xlu2 %v1103_v17, %s1900_s11  ;;  %1077 = vrot.lane.b32.xlu1 %v1075_v18, %s1904_s0  ;;  %v1151_v33 = vmul.f32 %v1150_v32, %v2256_v16  ;;  %v1100_v54 = vmul.f32 %v1099_v52, %v2256_v16  ;;  %v1167_v63 = vmul.f32 %v1166_v62, %v2256_v16 }
 0x494   : > { %1069 = vrot.lane.b32.xlu0 %v1067_v20, %s1900_s11  ;;  %v1199_v4 = vmul.f32 %v1198_v3, %v2256_v16  ;;  %v1148_v7 = vmul.f32 %v1147_v5, %v2256_v16 }
 0x498   : > { %v746_v24 = vpop.permute.xlu1 %745 }
 0x499   : > { %749 = vst.msk [vmem:[#allocation4] sm:$0xff] %vm748_vm12, %v746_v24  ;;  %v1587_v24 = vld [vmem:[%s2431_s18 + $0x18] sm:$0xff] }
 0x49a   : > { %1287 = vmatpush.bf16.msra.mxu3 %v1587_v24 }
 0x49b   : > { %1161 = vrot.lane.b32.xlu2 %v1159_v25, %s1904_s0  ;;  %1113 = vrot.lane.b32.xlu1 %v1111_v26, %s1904_s0  ;;  %v1586_v25 = vld [vmem:[%s2431_s18 + $0x10] sm:$0xff] }
 0x49c   : > { %1085 = vrot.lane.b32.xlu0 %v1083_v27, %s1902_s30 }
 0x49e   : > { %1288 = vmatpush.bf16.msra.mxu3 %v1586_v25 }
 0x4a0   : > { %v1090_v47 = vld [vmem:[#allocation4] sm:$0xff] }
 0x4a3   : > { %1184 = vrot.lane.b32.xlu2 %v2154_v19, %s1905_s28  ;;  %s1062_s28 = sld [smem:[#allocation9]] }
 0x4a4   : > { %1121 = vrot.lane.b32.xlu0 %v1119_v29, %s1902_s30 }
 0x4a9   : > { %v1063_v34 = vstv %s1062_s28 }
 0x4aa   : > { %v1064_v36 = vmul.f32 %v2256_v16, %v1063_v34  ;;  %v1224_v34 = vstv %s1558_s20 }
 0x4ab   : > { %1209 = vrot.lane.b32.xlu2 %v1207_v31, %s1904_s0 }
 0x4ac   : > { %1136 = vrot.lane.b32.xlu0 %v2154_v19, %s1904_s0 }
 0x4b3   : > { %1232 = vrot.lane.b32.xlu2 %v2154_v19, %s1906_s4 }
 0x4b4   : > { %1153 = vrot.lane.b32.xlu0 %v1151_v33, %s1900_s11 }
 0x4ed   : > { %v1106_v53 = vpop.permute.xlu2 %1105 }
 0x4ee   : > { %v1108_v57 = vadd.f32 %v1106_v53, %v1100_v54 }
 0x4f5   : > { %v1162_v8 = vpop.permute.xlu2 %1161 }
 0x4fd   : > { %v1185_v17 = vpop.permute.xlu2 %1184 }
 0x505   : > { %v1078_v38 = vpop.permute.xlu1 %1077  ;;  %v1210_v30 = vpop.permute.xlu2 %1209 }
 0x506   : > { %v1070_v35 = vpop.permute.xlu0 %1069 }
 0x507   : > { %v1072_v37 = vadd.f32 %v1070_v35, %v1064_v36 }
 0x509   : > { %v1080_v39 = vadd.f32 %v1078_v38, %v1072_v37 }
 0x50d   : > { %v1114_v55 = vpop.permute.xlu1 %1113  ;;  %v1233_v38 = vpop.permute.xlu2 %1232 }
 0x50e   : > { %v1086_v42 = vpop.permute.xlu0 %1085  ;;  %v1116_v59 = vadd.f32 %v1114_v55, %v1108_v57 }
 0x50f   : > { %v1088_v44 = vadd.f32 %v1086_v42, %v1080_v39 }
 0x511   : > { %v1093_v46 = vadd.f32 %v1092_v41, %v1088_v44  ;;  %v1584_v41 = vld [vmem:[%s2431_s18] sm:$0xff] }
 0x513   : > { %v1094_v49 = vadd.f32 %v1093_v46, %v1090_v47 }
 0x515   : > { %v1095_v50 = vmul.f32 %v1094_v49, %v2154_v19 }
 0x516   : > { %v1122_v48 = vpop.permute.xlu0 %1121 }
 0x517   : > { %1096 = vst.msk [vmem:[#allocation4] sm:$0xff] %vm673_vm2, %v1095_v50  ;;  %v1124_v40 = vadd.f32 %v1122_v48, %v1116_v59  ;;  %vm1279_vm2 = vcmask 523264  }
 0x519   : > { %v1129_v45 = vadd.f32 %v1128_v60, %v1124_v40 }
 0x51e   : > { %v1126_v51 = vld [vmem:[#allocation4] sm:$0xff]  ;;  %v1137_v58 = vpop.permute.xlu0 %1136 }
 0x51f   : > { %1131 = vrot.lane.b32.xlu1 %v1126_v51, %s1900_s11 }
 0x526   : > { %v1154_v6 = vpop.permute.xlu0 %1153 }
 0x527   : > { %v1156_v56 = vadd.f32 %v1154_v6, %v1148_v7 }
 0x529   : > { %v1164_v10 = vadd.f32 %v1162_v8, %v1156_v56 }
 0x591   : > { %v1132_v43 = vpop.permute.xlu1 %1131 }
 0x592   : > { %v1134_v19 = vadd.f32 %v1132_v43, %v1129_v45 }
 0x594   : > { %v1139_v61 = vmul.f32 %v1137_v58, %v1134_v19 }
 0x596   : > { %1141 = vrot.lane.b32.xlu1 %v1139_v61, %s1901_s12  ;;  %s1553_s12 = sld [smem:[#allocation10 + $0x2]] }
 0x59c   : > { %v1176_v12 = vstv %s1553_s12 }
 0x59e   : > { %1169 = vrot.lane.b32.xlu1 %v1167_v63, %s1902_s30 }
 0x608   : > { %v1142_v1 = vpop.permute.xlu1 %1141 }
 0x609   : > { %1144 = vst.msk [vmem:[#allocation4] sm:$0xff] %vm738_vm10, %v1142_v1 }
 0x610   : > { %v1174_v2 = vld [vmem:[#allocation4] sm:$0xff]  ;;  %v1170_v9 = vpop.permute.xlu1 %1169 }
 0x611   : > { %1179 = vrot.lane.b32.xlu0 %v1174_v2, %s1904_s0  ;;  %v1172_v11 = vadd.f32 %v1170_v9, %v1164_v10  ;;  %s1557_s0 = sld [smem:[#allocation9 + $0xf]] }
 0x613   : > { %v1177_v13 = vadd.f32 %v1176_v12, %v1172_v11 }
 0x617   : > { %v1214_v20 = vstv %s1557_s0 }
 0x618   : > { %v1215_v21 = vmul.f32 %v1214_v20, %v2256_v16 }
 0x619   : > { %1201 = vrot.lane.b32.xlu0 %v1199_v4, %s1900_s11 }
 0x683   : > { %v1180_v14 = vpop.permute.xlu0 %1179 }
 0x684   : > { %v1182_v15 = vadd.f32 %v1180_v14, %v1177_v13 }
 0x686   : > { %v1187_v18 = vmul.f32 %v1185_v17, %v1182_v15 }
 0x688   : > { %1189 = vrot.lane.b32.xlu1 %v1187_v18, %s1906_s4  ;;  %s1554_s4 = sld [smem:[#allocation9 + $0xc]] }
 0x68b   : > { %v1202_v27 = vpop.permute.xlu0 %1201 }
 0x68e   : > { %v1195_v26 = vstv %s1554_s4  ;;  %s1332_s4 = sshll.u32 %s2145_s27, 4  ;;  %s1333_s4 = int_to_ptr.vmem [resolvable:$true] %s1332_s4 }
 0x68f   : > { %v1196_v28 = vmul.f32 %v1195_v26, %v2256_v16  ;;  %v1585_v16 = vld [vmem:[%s2431_s18 + $0x8] sm:$0xff] }
 0x690   : > { %1217 = vrot.lane.b32.xlu1 %v1215_v21, %s1902_s30  ;;  %1289 = vmatpush.bf16.msra.mxu3 %v1585_v16 }
 0x691   : > { %v1204_v29 = vadd.f32 %v1202_v27, %v1196_v28 }
 0x693   : > { %v1212_v32 = vadd.f32 %v1210_v30, %v1204_v29 }
 0x694   : > { %1290 = vmatpush.bf16.msra.mxu3 %v1584_v41 }
 0x6fa   : > { %v1190_v22 = vpop.permute.xlu1 %1189 }
 0x6fb   : > { %1192 = vst.msk [vmem:[#allocation4] sm:$0xff] %vm743_vm11, %v1190_v22 }
 0x702   : > { %v1222_v23 = vld [vmem:[#allocation4] sm:$0xff]  ;;  %v1218_v31 = vpop.permute.xlu1 %1217 }
 0x703   : > { %1227 = vrot.lane.b32.xlu0 %v1222_v23, %s1902_s30  ;;  %v1220_v33 = vadd.f32 %v1218_v31, %v1212_v32  ;;  %s1304_s30 = scalar_lea.sflag [#allocation14], %s2084_s15 }
 0x705   : > { %v1225_v35 = vadd.f32 %v1224_v34, %v1220_v33 }
 0x775   : > { %v1228_v36 = vpop.permute.xlu0 %1227 }
 0x776   : > { %v1230_v37 = vadd.f32 %v1228_v36, %v1225_v35 }
 0x778   : > { %v1235_v39 = vmul.f32 %v1233_v38, %v1230_v37 }
 0x77a   : > { %1237 = vrot.lane.b32.xlu1 %v1235_v39, %s1899_s19  ;;  %s1578_s19 = sshll.u32 %s1886_s24, 3  ;;  %s1792_s24 = scalar_lea.hbm %s2433_s14, 16 }
 0x77b   : > { %s1330_s16 = scalar_lea.hbm %s2433_s14, %s1578_s19 }
 0x77c   : > { %s1334_s20 = sshll.u32 %s1330_s16, 4  ;;  %s1335_s20 = int_to_ptr.hbm [resolvable:$true] %s1334_s20 }
 0x77d   : > { %s1786_s29 = sshra.s32 %s1335_s20, 4  ;;  %s1787_s29 = int_to_ptr.hbm [resolvable:$true] %s1786_s29 }
 0x77e   : > { %s1788_s21 = scalar_lea.hbm %s1787_s29, 8  ;;  %p1793_p12 = scmp.lt.s32.totalorder %s1787_s29, %s2433_s14 }
 0x77f   : > { %p1789_p1 = scmp.ne.s32.totalorder %s1787_s29, %s1788_s21  ;;  %p1794_p13 = scmp.lt.s32.totalorder %s1792_s24, %s1788_s21 }
 0x781   : > { %p1790_p3 = pnand %p1789_p1, %p2064_p2  ;;  %p1795_p0 = por %p1794_p13, %p1793_p12 }
 0x783   : > { %p1791_p11 = pneg %p1790_p3 }
 0x785   : > { %p1796_p4 = pnand %p1795_p0, %p1791_p11 }
 0x7ec   : > { %v1238_v42 = vpop.permute.xlu1 %1237 }
 0x7ed   : > { %1240 = vst.msk [vmem:[#allocation4] sm:$0xff] %vm748_vm12, %v1238_v42 }
 0x7f4   : > { %v1241_v44 = vld [vmem:[#allocation4] sm:$0xff] }
 0x7f5   : > { %v1242_v46 = vpack.c.bf16 %v1241_v44, %v1241_v44 }
 0x7f7   : > { %1575 = vmatmul.msk.bf16.vlgmr.msra.gmra.mxu3 %vm1279_vm2, %v1242_v46 }
 0x7f8   : > { %1799 = shalt.err (!%p1796_p4)
}
 0x7f9   : > { %1599 = dma.vmem_to_hbm [thread:$0]  (%p2064_p2), %s1333_s4, 128, %s1335_s20, %s1304_s30  }
 0x7fa   : > { %s2434_s28 = sld [smem:[#allocation30_spill]]  ;;  %s2436_s2 = sshll.u32 %s2084_s15, 3 }
 0x7fb   : > { %s2435_s12 = sld [smem:[#allocation33_spill]]  ;;  %s640_s3 = scalar_lea.vmem [#allocation12], %s2436_s2 }
 0x7fc   : > { %s1317_s29 = sshll.u32 %s640_s3, 4  ;;  %s1299_s4 = scalar_lea.sflag [#allocation7], %s2084_s15  ;;  %s1318_s29 = int_to_ptr.vmem [resolvable:$true] %s1317_s29 }
 0x800   : > { %v1691_v47 = vld [vmem:[%s2434_s28] ss:$0 sm:$0xff] }
 0x801   : > { %s1315_s5 = scalar_lea.hbm %s2435_s12, %s1578_s19  ;;  %s1820_s27 = scalar_lea.hbm %s2435_s12, 16 }
 0x802   : > { %s1319_s21 = sshll.u32 %s1315_s5, 4  ;;  %s1320_s21 = int_to_ptr.hbm [resolvable:$true] %s1319_s21 }
 0x803   : > { %s1814_s20 = sshra.s32 %s1320_s21, 4  ;;  %s1815_s20 = int_to_ptr.hbm [resolvable:$true] %s1814_s20 }
 0x804   : > { %s1816_s30 = scalar_lea.hbm %s1815_s20, 8  ;;  %p1821_p7 = scmp.lt.s32.totalorder %s1815_s20, %s2435_s12 }
 0x805   : > { %p1817_p6 = scmp.ne.s32.totalorder %s1815_s20, %s1816_s30  ;;  %p1822_p1 = scmp.lt.s32.totalorder %s1820_s27, %s1816_s30 }
 0x807   : > { %p1818_p9 = pnand %p1817_p6, %p2064_p2  ;;  %p1823_p3 = por %p1822_p1, %p1821_p7 }
 0x809   : > { %p1819_p10 = pneg %p1818_p9 }
 0x80b   : > { %p1824_p11 = pnand %p1823_p3, %p1819_p10 }
 0x87a   : > { %v1292_v49 = vpop.f32.mrf.mxu3 }
 0x87b   : > { %v1293_v50 = vadd.f32 %v1691_v47, %v1292_v49 }
 0x87d   : > { %v1296_v51 = vadd.f32 %v1293_v50, %v2110_v0 }
 0x87f   : > { %1297 = vst.msk [vmem:[%s640_s3] sm:$0xff] %vm752_vm0, %v1296_v51 }
 0x880   : > { %1827 = shalt.err (!%p1824_p11)
}
 0x881   : > { %1598 = dma.vmem_to_hbm [thread:$0]  (%p2064_p2), %s1318_s29, 128, %s1320_s21, %s1299_s4  }
 0x882   : > { %v1294_v0 = vpop.f32.mrf.mxu3 }
 0x883 PF: > { %s2437_s15 = sld [smem:[#allocation20_spill]]  ;;  %p1614_p12 = pnand %p1517_p8, %p2037_p5 }
 0x885   : > { %p1615_p13 = pneg %p1614_p12 }
 0x889   : > { %s1346_s16 = sand.u32 1, %s2437_s15  }
 0x88a   : > { %s1347_s1 = scalar_lea.sflag [#allocation7], %s1346_s16 }
 0x88b   : > { %1865 = dma.done.wait (%p1615_p13), %s1347_s1, 128  }
 0x88c   : > { %1867 = vsyncadd (%p1615_p13), %s1347_s1, 4294967168  ;;  %s1357_s2 = scalar_lea.sflag [#allocation14], %s1346_s16 }
 0x88d   : > { %1869 = dma.done.wait (%p1615_p13), %s1357_s2, 128  }
 0x88e   : > { %1871 = vsyncadd (%p1615_p13), %s1357_s2, 4294967168  ;;  %s38_s26 = sadd.s32 1, %s1894_s26   ;;  %s2439_s21 = smov %s1878_s22 }
 0x88f   : > { %p35_p0 = scmp.ge.s32.totalorder %s38_s26, 4   ;;  %s2440_s22 = smov %s1882_s23 }
 0x890   : > { %s2441_s23 = smov %s2074_s17  ;;  %s2442_s24 = smov %s1890_s25 }
 0x891   : > { %s2443_s25 = smov %s2445_s13  ;;  %37 = sbr.rel (!%p35_p0) target bundleno = 23 (0x17), region = 160 }
 0x896   :  { %1363 = vsyncpa [#allocation6], 1 }
 0x897   :  { %1365 = vsyncpa [#allocation6 + $0x1], 1 }
 0x898   :  { %1366 = vsyncpa [#allocation7], 1 }
 0x899   :  { %1368 = vsyncpa [#allocation7 + $0x1], 1 }
 0x89a   :  { %1369 = vsyncpa [#allocation14], 1 }
 0x89b   :  { %1371 = vsyncpa [#allocation14 + $0x1], 1 }
 0x89c   :  { %1372 = vsyncpa [#allocation8], 1 }
 0x89d   :  { %1374 = vsyncpa [#allocation8 + $0x1], 1 }
 0x89e   :  { %1375 = vsyncpa [#allocation11], 1 }

</bundles_post_ra>
